<compile_context>
chip_gen: v7x
topology: tpu7x:2x2x1
jax: 0.10.0
libtpu: 0.0.40
codegen_flags: <defaults>
</compile_context>

<pallas_src>
import functools

import numpy as np
import jax
import jax.numpy as jnp
from jax import lax
from jax.experimental import pallas as pl
from jax.experimental.pallas import tpu as pltpu


_VMEM_LIMIT = 48 * 1024 * 1024   # leaves headroom under v7x's 64 MiB physical VMEM


def _pick_tile(h, target, multiple=1):
    """Largest row tile <= target that divides h and is a multiple of `multiple`."""
    th = max(multiple, min(target, h))
    th -= th % multiple
    while h % th:
        th -= multiple
    return th


# ---------------------------- Pallas kernels ----------------------------

def _conv_taps(x_ref, w_ref, b_ref, *, row_w, out_rows):
    """3x3 'same' conv + bias + ReLU for one image row-tile.

    x_ref : ((th+2)*row_w, 3*Cin) bf16 width-tap patches (2 halo rows included).
    w_ref : (3, 3*Cin, Cout) bf16 weights, resident across the whole grid.
    b_ref : (1, Cout) f32 bias.
    The 3 row (dh) taps are three accumulated MXU matmuls over row-shifted ref
    slices; static offsets dh*row_w are multiples of 16 (bf16 sublane aligned),
    so the loads need no relayout.  Accumulation and ReLU happen in f32.
    """
    cout = w_ref.shape[-1]
    acc = jnp.zeros((out_rows, cout), jnp.float32)
    for dh in range(3):                               # static unroll: 3 row taps
        acc = acc + jnp.dot(x_ref[pl.ds(dh * row_w, out_rows), :], w_ref[dh],
                            preferred_element_type=jnp.float32)
    return jnp.maximum(acc + b_ref[...], 0.0)


def _pool2x2_parity(a, *, th, w2r):
    """2x2/stride-2 max pool of activations whose rows are ordered (h, parity, w2).

    In this layout both pooling partners are a multiple-of-8 rows apart, so the
    pool is two layout-preserving leading-axis reshapes + elementwise maxima
    (pure VPU) -- no cross-lane work and no strided extraction.
    """
    c = a.shape[-1]
    a = a.reshape(th, 2, w2r, c)                      # (h, col-parity, w2, c)
    m = jnp.maximum(a[:, 0], a[:, 1])                 # max over column pairs
    m = m.reshape(th // 2, 2, w2r, c)                 # (h2, row-in-pair, w2, c)
    m = jnp.maximum(m[:, 0], m[:, 1])                 # max over row pairs
    return m.reshape((th // 2) * w2r, c)              # (h2*w2, c)


def _sse_partial(a_og, a_up):
    """Per-grid-step partial sum((a_og - a_up)^2), reduced to (1, Cout)."""
    d = a_og - a_up
    return jnp.sum(d * d, axis=0, keepdims=True)


def _conv1_pool_sse_kernel(og_ref, up_ref, w_ref, b_ref, pool_ref, sse_ref, *,
                           row_w, th, w2r):
    """Loss-path slice 0: conv+ReLU on both images, fused 2x2 pool + fused SSE.

    Only the pooled maps (og|up channel-packed to 128 lanes, bf16) and a
    (1, Cout) SSE partial leave the kernel; the full-resolution layer-0 feature
    maps never touch HBM.
    """
    out_rows = th * row_w
    a_og = _conv_taps(og_ref, w_ref, b_ref, row_w=row_w, out_rows=out_rows)
    a_up = _conv_taps(up_ref, w_ref, b_ref, row_w=row_w, out_rows=out_rows)
    sse_ref[...] = _sse_partial(a_og, a_up)
    p_og = _pool2x2_parity(a_og, th=th, w2r=w2r)
    p_up = _pool2x2_parity(a_up, th=th, w2r=w2r)
    pool_ref[...] = jnp.concatenate([p_og, p_up], axis=-1).astype(pool_ref.dtype)


def _conv_sse_kernel(og_ref, up_ref, w_ref, b_ref, sse_ref, *, row_w, th):
    """Loss-path slice 1: conv+ReLU on both images with the SSE fused."""
    out_rows = th * row_w
    a_og = _conv_taps(og_ref, w_ref, b_ref, row_w=row_w, out_rows=out_rows)
    a_up = _conv_taps(up_ref, w_ref, b_ref, row_w=row_w, out_rows=out_rows)
    sse_ref[...] = _sse_partial(a_og, a_up)


def _conv_feat_kernel(x_ref, w_ref, b_ref, f_ref, *, row_w, th):
    """Feature-extraction path (API parity): conv+ReLU, bf16 feature writeback."""
    f_ref[...] = _conv_taps(x_ref, w_ref, b_ref, row_w=row_w,
                            out_rows=th * row_w).astype(f_ref.dtype)


def _maxpool_kernel(a_ref, b_ref, c_ref, d_ref, o_ref):
    """2x2 max pool as an elementwise max of the 4 window corners."""
    o_ref[...] = jnp.maximum(jnp.maximum(a_ref[...], b_ref[...]),
                             jnp.maximum(c_ref[...], d_ref[...]))


# ---------------------------- patch builders (wrapper side) ----------------------------

def _row_tiles(p, th):
    """Slices (B, H+2, Wr, K) padded-row patches into overlapping row tiles.

    Tile i holds padded rows [i*th, i*th + th + 2): the 2 halo rows are
    duplicated by the wrapper so every grid step uses a plain Blocked block.
    """
    B, hp, wr, k = p.shape
    n_tiles = (hp - 2) // th
    idx = np.arange(n_tiles)[:, None] * th + np.arange(th + 2)[None, :]
    return p[:, idx].reshape(B, n_tiles, (th + 2) * wr, k)


def _dw_patches_tiled(x, th, dtype=jnp.bfloat16):
    """Width-tap patches, standard layout: p[.., h, w, dw*Cin+c] = x_pad[h, w+dw, c].

    Returns (B, H//th, (th+2)*Wr, 3*Cin) bf16 tiles plus the padded row stride
    Wr (W rounded up to 16 so in-kernel dh offsets stay bf16-sublane aligned).
    Zero-padded junk columns give identical activations for both images, so they
    contribute exactly 0 to the fused SSE and are sliced off elsewhere.
    """
    B, H, W, Cin = x.shape
    Wr = ((W + 15) // 16) * 16
    xp = jnp.pad(x, ((0, 0), (1, 1), (1, 1), (0, 0)))            # (B, H+2, W+2, Cin)
    p = jnp.concatenate([xp[:, :, dw:dw + W, :] for dw in range(3)], axis=-1)
    if Wr != W:
        p = jnp.pad(p, ((0, 0), (0, 0), (0, Wr - W), (0, 0)))
    return _row_tiles(p.astype(dtype), th), Wr


def _parity_patches_tiled(x, th, dtype=jnp.bfloat16):
    """Conv-1 patches with image columns de-interleaved by parity.

    Patch row (h, par, w2) holds x_pad[h, 2*w2 + par + dw, :] for dw in 0..2, so
    the in-kernel dh-shift trick is unchanged while both 2x2-pool partners end
    up a multiple-of-8 rows apart (pooling becomes leading-axis reshapes + max).
    Returns (B, H//th, (th+2)*Wr, 3*Cin) tiles and W2r (per-parity row width).
    """
    B, H, W, Cin = x.shape
    W2 = W // 2
    W2r = ((W2 + 7) // 8) * 8            # row stride Wr = 2*W2r (multiple of 16)
    xp = jnp.pad(x, ((0, 0), (1, 1), (1, 1), (0, 0)))
    par_blocks = []
    for par in (0, 1):
        taps = [xp[:, :, par + dw: par + dw + 2 * W2:2, :] for dw in range(3)]
        blk = jnp.concatenate(taps, axis=-1)          # (B, H+2, W2, 3*Cin)
        if W2r != W2:
            blk = jnp.pad(blk, ((0, 0), (0, 0), (0, W2r - W2), (0, 0)))
        par_blocks.append(blk)
    p = jnp.concatenate(par_blocks, axis=2)           # (B, H+2, 2*W2r, 3*Cin)
    return _row_tiles(p.astype(dtype), th), W2r


# ---------------------------- pallas_call wrappers ----------------------------

def _conv_pair_specs(rows_in, k, cout):
    return [
        pl.BlockSpec((None, None, rows_in, k), lambda n, i: (n, i, 0, 0)),
        pl.BlockSpec((None, None, rows_in, k), lambda n, i: (n, i, 0, 0)),
        pl.BlockSpec((3, k, cout), lambda n, i: (0, 0, 0)),       # resident weights
        pl.BlockSpec((1, cout), lambda n, i: (0, 0)),             # resident bias
    ]


def conv1_relu_pool_sse(x_og, x_up, w, b, *, tile_rows):
    """Loss-path slice 0: 3x3 conv + ReLU on the (og, up) pair with a fused 2x2
    maxpool and fused sum((relu_og - relu_up)^2).  Returns the pooled maps
    (bf16, NHWC) and the layer-0 SSE scalar."""
    N, H, W, Cin = x_og.shape
    assert x_up.shape == x_og.shape and H % 2 == 0 and W % 2 == 0
    Cout = w.shape[-1]
    th = _pick_tile(H, tile_rows, multiple=2)
    n_tiles = H // th

    p_og, w2r = _parity_patches_tiled(x_og, th)
    p_up, _ = _parity_patches_tiled(x_up, th)
    wr = 2 * w2r
    rows_in = (th + 2) * wr
    rows_pool = (th // 2) * w2r
    K = 3 * Cin
    w3 = w.reshape(3, K, Cout).astype(jnp.bfloat16)
    b2 = b.reshape(1, Cout).astype(jnp.float32)

    kern = functools.partial(_conv1_pool_sse_kernel, row_w=wr, th=th, w2r=w2r)
    pooled, sse = pl.pallas_call(
        kern,
        grid=(N, n_tiles),
        in_specs=_conv_pair_specs(rows_in, K, Cout),
        out_specs=(
            pl.BlockSpec((None, None, rows_pool, 2 * Cout), lambda n, i: (n, i, 0, 0)),
            pl.BlockSpec((None, None, 1, Cout), lambda n, i: (n, i, 0, 0)),
        ),
        out_shape=(
            jax.ShapeDtypeStruct((N, n_tiles, rows_pool, 2 * Cout), jnp.bfloat16),
            jax.ShapeDtypeStruct((N, n_tiles, 1, Cout), jnp.float32),
        ),
        compiler_params=pltpu.CompilerParams(
            dimension_semantics=("parallel", "parallel"),
            vmem_limit_bytes=_VMEM_LIMIT),
    )(p_og, p_up, w3, b2)

    # Unpack: (N, n_tiles, (th/2)*W2r, 2*Cout) -> (N, H/2, W/2, Cout) per image.
    pooled = pooled.reshape(N, n_tiles * (th // 2), w2r, 2 * Cout)[:, :, :W // 2, :]
    return pooled[..., :Cout], pooled[..., Cout:], jnp.sum(sse)


def conv_relu_sse(x_og, x_up, w, b, *, tile_rows):
    """Loss-path slice 1: 3x3 conv + ReLU on the (og, up) pair with the SSE
    fused; the (N, H, W, 128) feature maps never touch HBM."""
    N, H, W, Cin = x_og.shape
    assert x_up.shape == x_og.shape
    Cout = w.shape[-1]
    th = _pick_tile(H, tile_rows)
    n_tiles = H // th

    p_og, wr = _dw_patches_tiled(x_og, th)
    p_up, _ = _dw_patches_tiled(x_up, th)
    rows_in = (th + 2) * wr
    K = 3 * Cin
    w3 = w.reshape(3, K, Cout).astype(jnp.bfloat16)
    b2 = b.reshape(1, Cout).astype(jnp.float32)

    kern = functools.partial(_conv_sse_kernel, row_w=wr, th=th)
    sse = pl.pallas_call(
        kern,
        grid=(N, n_tiles),
        in_specs=_conv_pair_specs(rows_in, K, Cout),
        out_specs=pl.BlockSpec((None, None, 1, Cout), lambda n, i: (n, i, 0, 0)),
        out_shape=jax.ShapeDtypeStruct((N, n_tiles, 1, Cout), jnp.float32),
        compiler_params=pltpu.CompilerParams(
            dimension_semantics=("parallel", "parallel"),
            vmem_limit_bytes=_VMEM_LIMIT),
    )(p_og, p_up, w3, b2)
    return jnp.sum(sse)


def conv3x3_relu(x, w, b, *, tile_rows):
    """Feature-extraction path (API parity): 3x3 conv + ReLU, full-res features."""
    N, H, W, Cin = x.shape
    Cout = w.shape[-1]
    th = _pick_tile(H, tile_rows)
    n_tiles = H // th

    p, wr = _dw_patches_tiled(x, th)
    rows_in = (th + 2) * wr
    rows_out = th * wr
    K = 3 * Cin
    w3 = w.reshape(3, K, Cout).astype(jnp.bfloat16)
    b2 = b.reshape(1, Cout).astype(jnp.float32)

    kern = functools.partial(_conv_feat_kernel, row_w=wr, th=th)
    f = pl.pallas_call(
        kern,
        grid=(N, n_tiles),
        in_specs=[
            pl.BlockSpec((None, None, rows_in, K), lambda n, i: (n, i, 0, 0)),
            pl.BlockSpec((3, K, Cout), lambda n, i: (0, 0, 0)),
            pl.BlockSpec((1, Cout), lambda n, i: (0, 0)),
        ],
        out_specs=pl.BlockSpec((None, None, rows_out, Cout), lambda n, i: (n, i, 0, 0)),
        out_shape=jax.ShapeDtypeStruct((N, n_tiles, rows_out, Cout), jnp.bfloat16),
        compiler_params=pltpu.CompilerParams(
            dimension_semantics=("parallel", "parallel"),
            vmem_limit_bytes=_VMEM_LIMIT),
    )(p, w3, b2)
    f = f.reshape(N, n_tiles * th, wr, Cout)[:, :, :W, :]
    return f.astype(jnp.float32)


def maxpool2x2(x, *, tm=1024):
    """2x2/stride-2 max pool as a tiled elementwise max of the 4 window corners.
    Only used by get_reconstruction_features; the loss path fuses pooling into
    the conv-1 kernel instead."""
    B, H, W, C = x.shape
    assert H % 2 == 0 and W % 2 == 0
    Ho, Wo = H // 2, W // 2
    M = B * Ho * Wo
    corners = [x[:, dh::2, dw::2, :].reshape(M, C) for dh in (0, 1) for dw in (0, 1)]
    tm = min(tm, M)
    grid_m = pl.cdiv(M, tm)
    Mp = grid_m * tm
    if Mp != M:
        corners = [jnp.pad(c, ((0, Mp - M), (0, 0))) for c in corners]
    out = pl.pallas_call(
        _maxpool_kernel,
        out_shape=jax.ShapeDtypeStruct((Mp, C), x.dtype),
        grid=(grid_m,),
        in_specs=[pl.BlockSpec((tm, C), lambda i: (i, 0))] * 4,
        out_specs=pl.BlockSpec((tm, C), lambda i: (i, 0)),
        compiler_params=pltpu.CompilerParams(dimension_semantics=("parallel",)),
    )(*corners)
    return out[:M].reshape(B, Ho, Wo, C)


# ---------------------------- the module ----------------------------

class PerceptualLossPallas:
    """Pallas port of PerceptualLoss(selected_layers=(1, 4), model='vgg11')."""

    def __init__(self, key, tile_rows=64):
        # tile_rows: conv row-tile target at the layer-0 input resolution.  64
        # keeps per-step VMEM well under v7x's 64 MiB; 128-256 also fits v5e/v6e.
        self.tile_rows = tile_rows
        k1, k2, k3, k4 = jax.random.split(key, 4)
        # TODO(synk): deterministic synthetic weights stand in for the pretrained
        # torchvision VGG11 parameters (shapes follow vgg11.features[0]/[3]).
        def _snap(v):
            return v.astype(jnp.bfloat16).astype(jnp.float32)
        self.w1 = _snap(0.10 * jax.random.normal(k1, (3, 3, 3, 64)))
        self.b1 = _snap(0.01 * jax.random.normal(k2, (64,)))
        self.w2 = _snap(0.05 * jax.random.normal(k3, (3, 3, 64, 128)))
        self.b2 = _snap(0.01 * jax.random.normal(k4, (128,)))

    def get_reconstruction_features(self, image_nchw):
        """API parity with the PyTorch module (features returned NHWC, f32)."""
        x = jnp.transpose(image_nchw, (0, 2, 3, 1)).astype(jnp.float32)
        f0 = conv3x3_relu(x, self.w1, self.b1, tile_rows=self.tile_rows)
        f1 = conv3x3_relu(maxpool2x2(f0), self.w2, self.b2,
                          tile_rows=max(self.tile_rows // 2, 1))
        return [f0, f1]

    def __call__(self, original_nchw, upscaled_nchw):
        og = jnp.transpose(original_nchw, (0, 2, 3, 1)).astype(jnp.float32)
        up = jnp.transpose(upscaled_nchw, (0, 2, 3, 1)).astype(jnp.float32)
        N, H, W, _ = og.shape
        c1, c2 = self.w1.shape[-1], self.w2.shape[-1]

        # slice 0 (features[0:2]): conv(3->64)+ReLU on both images with the 2x2
        # maxpool and the layer-0 SSE fused into the same kernel.
        p_og, p_up, sse0 = conv1_relu_pool_sse(og, up, self.w1, self.b1,
                                               tile_rows=self.tile_rows)
        # slice 1 (features[2:5]): conv(64->128)+ReLU with the SSE fused; the
        # 128-channel feature maps never reach HBM.
        sse1 = conv_relu_sse(p_og, p_up, self.w2, self.b2,
                             tile_rows=max(self.tile_rows // 2, 1))

        loss0 = sse0 / jnp.float32(N * H * W * c1)
        loss1 = sse1 / jnp.float32(N * (H // 2) * (W // 2) * c2)
        return loss0 + loss1


# ---------------------------- pure-JAX reference ----------------------------

def _ref_conv_relu(x, w, b):
    y = lax.conv_general_dilated(x, w, (1, 1), 'SAME',
                                 dimension_numbers=('NHWC', 'HWIO', 'NHWC'),
                                 precision=lax.Precision.HIGHEST)
    return jnp.maximum(y + b[None, None, None, :], 0.0)


def _ref_maxpool(x):
    return lax.reduce_window(x, -jnp.inf, lax.max, (1, 2, 2, 1), (1, 2, 2, 1), 'VALID')


def _ref_features(model, x_nchw):
    x = jnp.transpose(x_nchw, (0, 2, 3, 1)).astype(jnp.float32)
    f0 = _ref_conv_relu(x, model.w1, model.b1)
    f1 = _ref_conv_relu(_ref_maxpool(f0), model.w2, model.b2)
    return [f0, f1]


def _ref_loss(model, og_nchw, up_nchw):
    fo = _ref_features(model, og_nchw)
    fu = _ref_features(model, up_nchw)
    return sum(jnp.mean((a - b) ** 2) for a, b in zip(fo, fu))


# ---------------------------- main ----------------------------

if __name__ == "__main__":
    key = jax.random.PRNGKey(0)
    kp, ko, ku = jax.random.split(key, 3)

    # Small row tile so the toy 16x16 inputs exercise the row-tiled/halo path.
    perceptual_loss = PerceptualLossPallas(kp, tile_rows=8)

    # PyTorch-style NCHW image inputs (small synthetic shapes).
    original_image = jax.random.normal(ko, (2, 3, 16, 16), jnp.float32)
    upscaled_image = jax.random.normal(ku, (2, 3, 16, 16), jnp.float32)

    loss_fn = jax.jit(perceptual_loss.__call__)
    loss = jax.block_until_ready(loss_fn(original_image, upscaled_image))
    ref = jax.block_until_ready(_ref_loss(perceptual_loss, original_image, upscaled_image))
    np.testing.assert_allclose(np.asarray(loss), np.asarray(ref), rtol=5e-3, atol=5e-3)

    feats = jax.block_until_ready(
        perceptual_loss.get_reconstruction_features(original_image))
    ref_feats = jax.block_until_ready(_ref_features(perceptual_loss, original_image))
    for got, want in zip(feats, ref_feats):
        np.testing.assert_allclose(np.asarray(got), np.asarray(want),
                                   rtol=2e-2, atol=3e-2)

    print("KERNEL_OK")
</pallas_src>

<mosaic_0001>
module attributes {stable_mosaic.version = 11 : i64} {
  func.func @_conv1_pool_sse_kernel(%arg0: i32, %arg1: i32, %arg2: memref<1x1x160x9xbf16, #tpu.memory_space<vmem>>, %arg3: memref<1x1x160x9xbf16, #tpu.memory_space<vmem>>, %arg4: memref<3x9x64xbf16, #tpu.memory_space<vmem>>, %arg5: memref<1x64xf32, #tpu.memory_space<vmem>>, %arg6: memref<1x1x32x128xbf16, #tpu.memory_space<vmem>>, %arg7: memref<1x1x1x64xf32, #tpu.memory_space<vmem>>) attributes {dimension_semantics = [#tpu.dimension_semantics<parallel>, #tpu.dimension_semantics<parallel>], iteration_bounds = array<i64: 2, 2>, scalar_prefetch = 0 : i64, scratch_operands = 0 : i64, tpu.core_type = #tpu.core_type<tc>, window_params = [{transform_indices = @transform_0, window_bounds = array<i64: 1, 1, 160, 9>}, {transform_indices = @transform_1, window_bounds = array<i64: 1, 1, 160, 9>}, {pipeline_mode = #tpu.pipeline_mode<synchronous>, transform_indices = @transform_2, window_bounds = array<i64: 3, 9, 64>}, {pipeline_mode = #tpu.pipeline_mode<synchronous>, transform_indices = @transform_3, window_bounds = array<i64: 1, 64>}, {transform_indices = @transform_4, window_bounds = array<i64: 1, 1, 32, 128>}, {transform_indices = @transform_5, window_bounds = array<i64: 1, 1, 1, 64>}]} {
    %cst = arith.constant 0.000000e+00 : f32
    %0 = vector.broadcast %cst : f32 to vector<128x64xf32>
    %c0 = arith.constant 0 : index
    %c0_0 = arith.constant 0 : index
    %c0_1 = arith.constant 0 : index
    %c0_2 = arith.constant 0 : index
    %1 = vector.load %arg2[%c0, %c0_0, %c0_1, %c0_2] : memref<1x1x160x9xbf16, #tpu.memory_space<vmem>>, vector<1x1x128x9xbf16>
    %2 = vector.shape_cast %1 : vector<1x1x128x9xbf16> to vector<128x9xbf16>
    %c0_3 = arith.constant 0 : index
    %c0_4 = arith.constant 0 : index
    %c0_5 = arith.constant 0 : index
    %3 = vector.load %arg4[%c0_3, %c0_4, %c0_5] : memref<3x9x64xbf16, #tpu.memory_space<vmem>>, vector<1x9x64xbf16>
    %4 = vector.shape_cast %3 : vector<1x9x64xbf16> to vector<9x64xbf16>
    %cst_6 = arith.constant dense<0.000000e+00> : vector<128x64xf32>
    %5 = tpu.matmul %2, %4, %cst_6 {dimension_numbers = #tpu.dot_dimension_numbers<[1], [0], [0], [1], [0, 0, 1, 1], [], []>} : vector<128x9xbf16>, vector<9x64xbf16>, vector<128x64xf32> -> vector<128x64xf32>
    %6 = arith.addf %0, %5 : vector<128x64xf32>
    %c0_7 = arith.constant 0 : index
    %c0_8 = arith.constant 0 : index
    %c16 = arith.constant 16 : index
    %c0_9 = arith.constant 0 : index
    %7 = vector.load %arg2[%c0_7, %c0_8, %c16, %c0_9] : memref<1x1x160x9xbf16, #tpu.memory_space<vmem>>, vector<1x1x128x9xbf16>
    %8 = vector.shape_cast %7 : vector<1x1x128x9xbf16> to vector<128x9xbf16>
    %c1 = arith.constant 1 : index
    %c0_10 = arith.constant 0 : index
    %c0_11 = arith.constant 0 : index
    %9 = vector.load %arg4[%c1, %c0_10, %c0_11] : memref<3x9x64xbf16, #tpu.memory_space<vmem>>, vector<1x9x64xbf16>
    %10 = vector.shape_cast %9 : vector<1x9x64xbf16> to vector<9x64xbf16>
    %cst_12 = arith.constant dense<0.000000e+00> : vector<128x64xf32>
    %11 = tpu.matmul %8, %10, %cst_12 {dimension_numbers = #tpu.dot_dimension_numbers<[1], [0], [0], [1], [0, 0, 1, 1], [], []>} : vector<128x9xbf16>, vector<9x64xbf16>, vector<128x64xf32> -> vector<128x64xf32>
    %12 = arith.addf %6, %11 : vector<128x64xf32>
    %c0_13 = arith.constant 0 : index
    %c0_14 = arith.constant 0 : index
    %c32 = arith.constant 32 : index
    %c0_15 = arith.constant 0 : index
    %13 = vector.load %arg2[%c0_13, %c0_14, %c32, %c0_15] : memref<1x1x160x9xbf16, #tpu.memory_space<vmem>>, vector<1x1x128x9xbf16>
    %14 = vector.shape_cast %13 : vector<1x1x128x9xbf16> to vector<128x9xbf16>
    %c2 = arith.constant 2 : index
    %c0_16 = arith.constant 0 : index
    %c0_17 = arith.constant 0 : index
    %15 = vector.load %arg4[%c2, %c0_16, %c0_17] : memref<3x9x64xbf16, #tpu.memory_space<vmem>>, vector<1x9x64xbf16>
    %16 = vector.shape_cast %15 : vector<1x9x64xbf16> to vector<9x64xbf16>
    %cst_18 = arith.constant dense<0.000000e+00> : vector<128x64xf32>
    %17 = tpu.matmul %14, %16, %cst_18 {dimension_numbers = #tpu.dot_dimension_numbers<[1], [0], [0], [1], [0, 0, 1, 1], [], []>} : vector<128x9xbf16>, vector<9x64xbf16>, vector<128x64xf32> -> vector<128x64xf32>
    %18 = arith.addf %12, %17 : vector<128x64xf32>
    %c0_19 = arith.constant 0 : index
    %c0_20 = arith.constant 0 : index
    %19 = vector.load %arg5[%c0_19, %c0_20] : memref<1x64xf32, #tpu.memory_space<vmem>>, vector<1x64xf32>
    %20 = vector.broadcast %19 : vector<1x64xf32> to vector<128x64xf32>
    %21 = arith.addf %18, %20 : vector<128x64xf32>
    %cst_21 = arith.constant 0.000000e+00 : f32
    %22 = vector.broadcast %cst_21 : f32 to vector<128x64xf32>
    %23 = arith.maximumf %21, %22 : vector<128x64xf32>
    %cst_22 = arith.constant 0.000000e+00 : f32
    %24 = vector.broadcast %cst_22 : f32 to vector<128x64xf32>
    %c0_23 = arith.constant 0 : index
    %c0_24 = arith.constant 0 : index
    %c0_25 = arith.constant 0 : index
    %c0_26 = arith.constant 0 : index
    %25 = vector.load %arg3[%c0_23, %c0_24, %c0_25, %c0_26] : memref<1x1x160x9xbf16, #tpu.memory_space<vmem>>, vector<1x1x128x9xbf16>
    %26 = vector.shape_cast %25 : vector<1x1x128x9xbf16> to vector<128x9xbf16>
    %c0_27 = arith.constant 0 : index
    %c0_28 = arith.constant 0 : index
    %c0_29 = arith.constant 0 : index
    %27 = vector.load %arg4[%c0_27, %c0_28, %c0_29] : memref<3x9x64xbf16, #tpu.memory_space<vmem>>, vector<1x9x64xbf16>
    %28 = vector.shape_cast %27 : vector<1x9x64xbf16> to vector<9x64xbf16>
    %cst_30 = arith.constant dense<0.000000e+00> : vector<128x64xf32>
    %29 = tpu.matmul %26, %28, %cst_30 {dimension_numbers = #tpu.dot_dimension_numbers<[1], [0], [0], [1], [0, 0, 1, 1], [], []>} : vector<128x9xbf16>, vector<9x64xbf16>, vector<128x64xf32> -> vector<128x64xf32>
    %30 = arith.addf %24, %29 : vector<128x64xf32>
    %c0_31 = arith.constant 0 : index
    %c0_32 = arith.constant 0 : index
    %c16_33 = arith.constant 16 : index
    %c0_34 = arith.constant 0 : index
    %31 = vector.load %arg3[%c0_31, %c0_32, %c16_33, %c0_34] : memref<1x1x160x9xbf16, #tpu.memory_space<vmem>>, vector<1x1x128x9xbf16>
    %32 = vector.shape_cast %31 : vector<1x1x128x9xbf16> to vector<128x9xbf16>
    %c1_35 = arith.constant 1 : index
    %c0_36 = arith.constant 0 : index
    %c0_37 = arith.constant 0 : index
    %33 = vector.load %arg4[%c1_35, %c0_36, %c0_37] : memref<3x9x64xbf16, #tpu.memory_space<vmem>>, vector<1x9x64xbf16>
    %34 = vector.shape_cast %33 : vector<1x9x64xbf16> to vector<9x64xbf16>
    %cst_38 = arith.constant dense<0.000000e+00> : vector<128x64xf32>
    %35 = tpu.matmul %32, %34, %cst_38 {dimension_numbers = #tpu.dot_dimension_numbers<[1], [0], [0], [1], [0, 0, 1, 1], [], []>} : vector<128x9xbf16>, vector<9x64xbf16>, vector<128x64xf32> -> vector<128x64xf32>
    %36 = arith.addf %30, %35 : vector<128x64xf32>
    %c0_39 = arith.constant 0 : index
    %c0_40 = arith.constant 0 : index
    %c32_41 = arith.constant 32 : index
    %c0_42 = arith.constant 0 : index
    %37 = vector.load %arg3[%c0_39, %c0_40, %c32_41, %c0_42] : memref<1x1x160x9xbf16, #tpu.memory_space<vmem>>, vector<1x1x128x9xbf16>
    %38 = vector.shape_cast %37 : vector<1x1x128x9xbf16> to vector<128x9xbf16>
    %c2_43 = arith.constant 2 : index
    %c0_44 = arith.constant 0 : index
    %c0_45 = arith.constant 0 : index
    %39 = vector.load %arg4[%c2_43, %c0_44, %c0_45] : memref<3x9x64xbf16, #tpu.memory_space<vmem>>, vector<1x9x64xbf16>
    %40 = vector.shape_cast %39 : vector<1x9x64xbf16> to vector<9x64xbf16>
    %cst_46 = arith.constant dense<0.000000e+00> : vector<128x64xf32>
    %41 = tpu.matmul %38, %40, %cst_46 {dimension_numbers = #tpu.dot_dimension_numbers<[1], [0], [0], [1], [0, 0, 1, 1], [], []>} : vector<128x9xbf16>, vector<9x64xbf16>, vector<128x64xf32> -> vector<128x64xf32>
    %42 = arith.addf %36, %41 : vector<128x64xf32>
    %c0_47 = arith.constant 0 : index
    %c0_48 = arith.constant 0 : index
    %43 = vector.load %arg5[%c0_47, %c0_48] : memref<1x64xf32, #tpu.memory_space<vmem>>, vector<1x64xf32>
    %44 = vector.broadcast %43 : vector<1x64xf32> to vector<128x64xf32>
    %45 = arith.addf %42, %44 : vector<128x64xf32>
    %cst_49 = arith.constant 0.000000e+00 : f32
    %46 = vector.broadcast %cst_49 : f32 to vector<128x64xf32>
    %47 = arith.maximumf %45, %46 : vector<128x64xf32>
    %48 = arith.subf %23, %47 : vector<128x64xf32>
    %49 = arith.mulf %48, %48 : vector<128x64xf32>
    %cst_50 = arith.constant dense<0.000000e+00> : vector<64xf32>
    %50 = vector.multi_reduction <add>, %49, %cst_50 [0] : vector<128x64xf32> to vector<64xf32>
    %51 = vector.shape_cast %50 : vector<64xf32> to vector<1x64xf32>
    %c0_51 = arith.constant 0 : index
    %c0_52 = arith.constant 0 : index
    %c0_53 = arith.constant 0 : index
    %c0_54 = arith.constant 0 : index
    %52 = vector.load %arg7[%c0_51, %c0_52, %c0_53, %c0_54] : memref<1x1x1x64xf32, #tpu.memory_space<vmem>>, vector<1x1x1x64xf32>
    %53 = vector.shape_cast %52 : vector<1x1x1x64xf32> to vector<1x64xf32>
    %54 = vector.shape_cast %51 : vector<1x64xf32> to vector<1x1x1x64xf32>
    tpu.vector_store %arg7[%c0_51, %c0_52, %c0_53, %c0_54], %54 {strides = array<i32>} : memref<1x1x1x64xf32, #tpu.memory_space<vmem>>, vector<1x1x1x64xf32>,
    %55 = vector.shape_cast %23 : vector<128x64xf32> to vector<8x2x8x64xf32>
    %56 = vector.extract_strided_slice %55 {offsets = [0, 0, 0, 0], sizes = [8, 1, 8, 64], strides = [1, 1, 1, 1]} : vector<8x2x8x64xf32> to vector<8x1x8x64xf32>
    %57 = vector.shape_cast %56 : vector<8x1x8x64xf32> to vector<8x8x64xf32>
    %58 = vector.extract_strided_slice %55 {offsets = [0, 1, 0, 0], sizes = [8, 1, 8, 64], strides = [1, 1, 1, 1]} : vector<8x2x8x64xf32> to vector<8x1x8x64xf32>
    %59 = vector.shape_cast %58 : vector<8x1x8x64xf32> to vector<8x8x64xf32>
    %60 = arith.maximumf %57, %59 : vector<8x8x64xf32>
    %61 = vector.shape_cast %60 : vector<8x8x64xf32> to vector<4x2x8x64xf32>
    %62 = vector.extract_strided_slice %61 {offsets = [0, 0, 0, 0], sizes = [4, 1, 8, 64], strides = [1, 1, 1, 1]} : vector<4x2x8x64xf32> to vector<4x1x8x64xf32>
    %63 = vector.shape_cast %62 : vector<4x1x8x64xf32> to vector<4x8x64xf32>
    %64 = vector.extract_strided_slice %61 {offsets = [0, 1, 0, 0], sizes = [4, 1, 8, 64], strides = [1, 1, 1, 1]} : vector<4x2x8x64xf32> to vector<4x1x8x64xf32>
    %65 = vector.shape_cast %64 : vector<4x1x8x64xf32> to vector<4x8x64xf32>
    %66 = arith.maximumf %63, %65 : vector<4x8x64xf32>
    %67 = vector.shape_cast %66 : vector<4x8x64xf32> to vector<32x64xf32>
    %68 = vector.shape_cast %47 : vector<128x64xf32> to vector<8x2x8x64xf32>
    %69 = vector.extract_strided_slice %68 {offsets = [0, 0, 0, 0], sizes = [8, 1, 8, 64], strides = [1, 1, 1, 1]} : vector<8x2x8x64xf32> to vector<8x1x8x64xf32>
    %70 = vector.shape_cast %69 : vector<8x1x8x64xf32> to vector<8x8x64xf32>
    %71 = vector.extract_strided_slice %68 {offsets = [0, 1, 0, 0], sizes = [8, 1, 8, 64], strides = [1, 1, 1, 1]} : vector<8x2x8x64xf32> to vector<8x1x8x64xf32>
    %72 = vector.shape_cast %71 : vector<8x1x8x64xf32> to vector<8x8x64xf32>
    %73 = arith.maximumf %70, %72 : vector<8x8x64xf32>
    %74 = vector.shape_cast %73 : vector<8x8x64xf32> to vector<4x2x8x64xf32>
    %75 = vector.extract_strided_slice %74 {offsets = [0, 0, 0, 0], sizes = [4, 1, 8, 64], strides = [1, 1, 1, 1]} : vector<4x2x8x64xf32> to vector<4x1x8x64xf32>
    %76 = vector.shape_cast %75 : vector<4x1x8x64xf32> to vector<4x8x64xf32>
    %77 = vector.extract_strided_slice %74 {offsets = [0, 1, 0, 0], sizes = [4, 1, 8, 64], strides = [1, 1, 1, 1]} : vector<4x2x8x64xf32> to vector<4x1x8x64xf32>
    %78 = vector.shape_cast %77 : vector<4x1x8x64xf32> to vector<4x8x64xf32>
    %79 = arith.maximumf %76, %78 : vector<4x8x64xf32>
    %80 = vector.shape_cast %79 : vector<4x8x64xf32> to vector<32x64xf32>
    %81 = tpu.concatenate %67, %80 in 1 : vector<32x64xf32>, vector<32x64xf32> -> vector<32x128xf32>
    %82 = arith.truncf %81 : vector<32x128xf32> to vector<32x128xbf16>
    %c0_55 = arith.constant 0 : index
    %c0_56 = arith.constant 0 : index
    %c0_57 = arith.constant 0 : index
    %c0_58 = arith.constant 0 : index
    %83 = vector.load %arg6[%c0_55, %c0_56, %c0_57, %c0_58] : memref<1x1x32x128xbf16, #tpu.memory_space<vmem>>, vector<1x1x32x128xbf16>
    %84 = vector.shape_cast %83 : vector<1x1x32x128xbf16> to vector<32x128xbf16>
    %85 = vector.shape_cast %82 : vector<32x128xbf16> to vector<1x1x32x128xbf16>
    tpu.vector_store %arg6[%c0_55, %c0_56, %c0_57, %c0_58], %85 {strides = array<i32>} : memref<1x1x32x128xbf16, #tpu.memory_space<vmem>>, vector<1x1x32x128xbf16>,
    return
  }
  func.func @transform_0(%arg0: i32, %arg1: i32) -> (i32, i32, i32, i32) {
    %c0_i32 = arith.constant 0 : i32
    %c0_i32_0 = arith.constant 0 : i32
    %c0_i32_1 = arith.constant 0 : i32
    return %arg0, %arg1, %c0_i32, %c0_i32_0 : i32, i32, i32, i32
  }
  func.func @transform_1(%arg0: i32, %arg1: i32) -> (i32, i32, i32, i32) {
    %c0_i32 = arith.constant 0 : i32
    %c0_i32_0 = arith.constant 0 : i32
    %c0_i32_1 = arith.constant 0 : i32
    return %arg0, %arg1, %c0_i32, %c0_i32_0 : i32, i32, i32, i32
  }
  func.func @transform_2(%arg0: i32, %arg1: i32) -> (i32, i32, i32) {
    %c0_i32 = arith.constant 0 : i32
    %c0_i32_0 = arith.constant 0 : i32
    %c0_i32_1 = arith.constant 0 : i32
    %c0_i32_2 = arith.constant 0 : i32
    return %c0_i32, %c0_i32_0, %c0_i32_1 : i32, i32, i32
  }
  func.func @transform_3(%arg0: i32, %arg1: i32) -> (i32, i32) {
    %c0_i32 = arith.constant 0 : i32
    %c0_i32_0 = arith.constant 0 : i32
    %c0_i32_1 = arith.constant 0 : i32
    return %c0_i32, %c0_i32_0 : i32, i32
  }
  func.func @transform_4(%arg0: i32, %arg1: i32) -> (i32, i32, i32, i32) {
    %c0_i32 = arith.constant 0 : i32
    %c0_i32_0 = arith.constant 0 : i32
    %c0_i32_1 = arith.constant 0 : i32
    return %arg0, %arg1, %c0_i32, %c0_i32_0 : i32, i32, i32, i32
  }
  func.func @transform_5(%arg0: i32, %arg1: i32) -> (i32, i32, i32, i32) {
    %c0_i32 = arith.constant 0 : i32
    %c0_i32_0 = arith.constant 0 : i32
    %c0_i32_1 = arith.constant 0 : i32
    return %arg0, %arg1, %c0_i32, %c0_i32_0 : i32, i32, i32, i32
  }
}

module attributes {stable_mosaic.version = 11 : i64} {
  func.func @_conv_sse_kernel(%arg0: i32, %arg1: i32, %arg2: memref<1x1x96x192xbf16, #tpu.memory_space<vmem>>, %arg3: memref<1x1x96x192xbf16, #tpu.memory_space<vmem>>, %arg4: memref<3x192x128xbf16, #tpu.memory_space<vmem>>, %arg5: memref<1x128xf32, #tpu.memory_space<vmem>>, %arg6: memref<1x1x1x128xf32, #tpu.memory_space<vmem>>) attributes {dimension_semantics = [#tpu.dimension_semantics<parallel>, #tpu.dimension_semantics<parallel>], iteration_bounds = array<i64: 2, 2>, scalar_prefetch = 0 : i64, scratch_operands = 0 : i64, tpu.core_type = #tpu.core_type<tc>, window_params = [{transform_indices = @transform_0, window_bounds = array<i64: 1, 1, 96, 192>}, {transform_indices = @transform_1, window_bounds = array<i64: 1, 1, 96, 192>}, {pipeline_mode = #tpu.pipeline_mode<synchronous>, transform_indices = @transform_2, window_bounds = array<i64: 3, 192, 128>}, {pipeline_mode = #tpu.pipeline_mode<synchronous>, transform_indices = @transform_3, window_bounds = array<i64: 1, 128>}, {transform_indices = @transform_4, window_bounds = array<i64: 1, 1, 1, 128>}]} {
    %cst = arith.constant 0.000000e+00 : f32
    %0 = vector.broadcast %cst : f32 to vector<64x128xf32>
    %c0 = arith.constant 0 : index
    %c0_0 = arith.constant 0 : index
    %c0_1 = arith.constant 0 : index
    %c0_2 = arith.constant 0 : index
    %1 = vector.load %arg2[%c0, %c0_0, %c0_1, %c0_2] : memref<1x1x96x192xbf16, #tpu.memory_space<vmem>>, vector<1x1x64x192xbf16>
    %2 = vector.shape_cast %1 : vector<1x1x64x192xbf16> to vector<64x192xbf16>
    %c0_3 = arith.constant 0 : index
    %c0_4 = arith.constant 0 : index
    %c0_5 = arith.constant 0 : index
    %3 = vector.load %arg4[%c0_3, %c0_4, %c0_5] : memref<3x192x128xbf16, #tpu.memory_space<vmem>>, vector<1x192x128xbf16>
    %4 = vector.shape_cast %3 : vector<1x192x128xbf16> to vector<192x128xbf16>
    %cst_6 = arith.constant dense<0.000000e+00> : vector<64x128xf32>
    %5 = tpu.matmul %2, %4, %cst_6 {dimension_numbers = #tpu.dot_dimension_numbers<[1], [0], [0], [1], [0, 0, 1, 1], [], []>} : vector<64x192xbf16>, vector<192x128xbf16>, vector<64x128xf32> -> vector<64x128xf32>
    %6 = arith.addf %0, %5 : vector<64x128xf32>
    %c0_7 = arith.constant 0 : index
    %c0_8 = arith.constant 0 : index
    %c16 = arith.constant 16 : index
    %c0_9 = arith.constant 0 : index
    %7 = vector.load %arg2[%c0_7, %c0_8, %c16, %c0_9] : memref<1x1x96x192xbf16, #tpu.memory_space<vmem>>, vector<1x1x64x192xbf16>
    %8 = vector.shape_cast %7 : vector<1x1x64x192xbf16> to vector<64x192xbf16>
    %c1 = arith.constant 1 : index
    %c0_10 = arith.constant 0 : index
    %c0_11 = arith.constant 0 : index
    %9 = vector.load %arg4[%c1, %c0_10, %c0_11] : memref<3x192x128xbf16, #tpu.memory_space<vmem>>, vector<1x192x128xbf16>
    %10 = vector.shape_cast %9 : vector<1x192x128xbf16> to vector<192x128xbf16>
    %cst_12 = arith.constant dense<0.000000e+00> : vector<64x128xf32>
    %11 = tpu.matmul %8, %10, %cst_12 {dimension_numbers = #tpu.dot_dimension_numbers<[1], [0], [0], [1], [0, 0, 1, 1], [], []>} : vector<64x192xbf16>, vector<192x128xbf16>, vector<64x128xf32> -> vector<64x128xf32>
    %12 = arith.addf %6, %11 : vector<64x128xf32>
    %c0_13 = arith.constant 0 : index
    %c0_14 = arith.constant 0 : index
    %c32 = arith.constant 32 : index
    %c0_15 = arith.constant 0 : index
    %13 = vector.load %arg2[%c0_13, %c0_14, %c32, %c0_15] : memref<1x1x96x192xbf16, #tpu.memory_space<vmem>>, vector<1x1x64x192xbf16>
    %14 = vector.shape_cast %13 : vector<1x1x64x192xbf16> to vector<64x192xbf16>
    %c2 = arith.constant 2 : index
    %c0_16 = arith.constant 0 : index
    %c0_17 = arith.constant 0 : index
    %15 = vector.load %arg4[%c2, %c0_16, %c0_17] : memref<3x192x128xbf16, #tpu.memory_space<vmem>>, vector<1x192x128xbf16>
    %16 = vector.shape_cast %15 : vector<1x192x128xbf16> to vector<192x128xbf16>
    %cst_18 = arith.constant dense<0.000000e+00> : vector<64x128xf32>
    %17 = tpu.matmul %14, %16, %cst_18 {dimension_numbers = #tpu.dot_dimension_numbers<[1], [0], [0], [1], [0, 0, 1, 1], [], []>} : vector<64x192xbf16>, vector<192x128xbf16>, vector<64x128xf32> -> vector<64x128xf32>
    %18 = arith.addf %12, %17 : vector<64x128xf32>
    %c0_19 = arith.constant 0 : index
    %c0_20 = arith.constant 0 : index
    %19 = vector.load %arg5[%c0_19, %c0_20] : memref<1x128xf32, #tpu.memory_space<vmem>>, vector<1x128xf32>
    %20 = vector.broadcast %19 : vector<1x128xf32> to vector<64x128xf32>
    %21 = arith.addf %18, %20 : vector<64x128xf32>
    %cst_21 = arith.constant 0.000000e+00 : f32
    %22 = vector.broadcast %cst_21 : f32 to vector<64x128xf32>
    %23 = arith.maximumf %21, %22 : vector<64x128xf32>
    %cst_22 = arith.constant 0.000000e+00 : f32
    %24 = vector.broadcast %cst_22 : f32 to vector<64x128xf32>
    %c0_23 = arith.constant 0 : index
    %c0_24 = arith.constant 0 : index
    %c0_25 = arith.constant 0 : index
    %c0_26 = arith.constant 0 : index
    %25 = vector.load %arg3[%c0_23, %c0_24, %c0_25, %c0_26] : memref<1x1x96x192xbf16, #tpu.memory_space<vmem>>, vector<1x1x64x192xbf16>
    %26 = vector.shape_cast %25 : vector<1x1x64x192xbf16> to vector<64x192xbf16>
    %c0_27 = arith.constant 0 : index
    %c0_28 = arith.constant 0 : index
    %c0_29 = arith.constant 0 : index
    %27 = vector.load %arg4[%c0_27, %c0_28, %c0_29] : memref<3x192x128xbf16, #tpu.memory_space<vmem>>, vector<1x192x128xbf16>
    %28 = vector.shape_cast %27 : vector<1x192x128xbf16> to vector<192x128xbf16>
    %cst_30 = arith.constant dense<0.000000e+00> : vector<64x128xf32>
    %29 = tpu.matmul %26, %28, %cst_30 {dimension_numbers = #tpu.dot_dimension_numbers<[1], [0], [0], [1], [0, 0, 1, 1], [], []>} : vector<64x192xbf16>, vector<192x128xbf16>, vector<64x128xf32> -> vector<64x128xf32>
    %30 = arith.addf %24, %29 : vector<64x128xf32>
    %c0_31 = arith.constant 0 : index
    %c0_32 = arith.constant 0 : index
    %c16_33 = arith.constant 16 : index
    %c0_34 = arith.constant 0 : index
    %31 = vector.load %arg3[%c0_31, %c0_32, %c16_33, %c0_34] : memref<1x1x96x192xbf16, #tpu.memory_space<vmem>>, vector<1x1x64x192xbf16>
    %32 = vector.shape_cast %31 : vector<1x1x64x192xbf16> to vector<64x192xbf16>
    %c1_35 = arith.constant 1 : index
    %c0_36 = arith.constant 0 : index
    %c0_37 = arith.constant 0 : index
    %33 = vector.load %arg4[%c1_35, %c0_36, %c0_37] : memref<3x192x128xbf16, #tpu.memory_space<vmem>>, vector<1x192x128xbf16>
    %34 = vector.shape_cast %33 : vector<1x192x128xbf16> to vector<192x128xbf16>
    %cst_38 = arith.constant dense<0.000000e+00> : vector<64x128xf32>
    %35 = tpu.matmul %32, %34, %cst_38 {dimension_numbers = #tpu.dot_dimension_numbers<[1], [0], [0], [1], [0, 0, 1, 1], [], []>} : vector<64x192xbf16>, vector<192x128xbf16>, vector<64x128xf32> -> vector<64x128xf32>
    %36 = arith.addf %30, %35 : vector<64x128xf32>
    %c0_39 = arith.constant 0 : index
    %c0_40 = arith.constant 0 : index
    %c32_41 = arith.constant 32 : index
    %c0_42 = arith.constant 0 : index
    %37 = vector.load %arg3[%c0_39, %c0_40, %c32_41, %c0_42] : memref<1x1x96x192xbf16, #tpu.memory_space<vmem>>, vector<1x1x64x192xbf16>
    %38 = vector.shape_cast %37 : vector<1x1x64x192xbf16> to vector<64x192xbf16>
    %c2_43 = arith.constant 2 : index
    %c0_44 = arith.constant 0 : index
    %c0_45 = arith.constant 0 : index
    %39 = vector.load %arg4[%c2_43, %c0_44, %c0_45] : memref<3x192x128xbf16, #tpu.memory_space<vmem>>, vector<1x192x128xbf16>
    %40 = vector.shape_cast %39 : vector<1x192x128xbf16> to vector<192x128xbf16>
    %cst_46 = arith.constant dense<0.000000e+00> : vector<64x128xf32>
    %41 = tpu.matmul %38, %40, %cst_46 {dimension_numbers = #tpu.dot_dimension_numbers<[1], [0], [0], [1], [0, 0, 1, 1], [], []>} : vector<64x192xbf16>, vector<192x128xbf16>, vector<64x128xf32> -> vector<64x128xf32>
    %42 = arith.addf %36, %41 : vector<64x128xf32>
    %c0_47 = arith.constant 0 : index
    %c0_48 = arith.constant 0 : index
    %43 = vector.load %arg5[%c0_47, %c0_48] : memref<1x128xf32, #tpu.memory_space<vmem>>, vector<1x128xf32>
    %44 = vector.broadcast %43 : vector<1x128xf32> to vector<64x128xf32>
    %45 = arith.addf %42, %44 : vector<64x128xf32>
    %cst_49 = arith.constant 0.000000e+00 : f32
    %46 = vector.broadcast %cst_49 : f32 to vector<64x128xf32>
    %47 = arith.maximumf %45, %46 : vector<64x128xf32>
    %48 = arith.subf %23, %47 : vector<64x128xf32>
    %49 = arith.mulf %48, %48 : vector<64x128xf32>
    %cst_50 = arith.constant dense<0.000000e+00> : vector<128xf32>
    %50 = vector.multi_reduction <add>, %49, %cst_50 [0] : vector<64x128xf32> to vector<128xf32>
    %51 = vector.shape_cast %50 : vector<128xf32> to vector<1x128xf32>
    %c0_51 = arith.constant 0 : index
    %c0_52 = arith.constant 0 : index
    %c0_53 = arith.constant 0 : index
    %c0_54 = arith.constant 0 : index
    %52 = vector.load %arg6[%c0_51, %c0_52, %c0_53, %c0_54] : memref<1x1x1x128xf32, #tpu.memory_space<vmem>>, vector<1x1x1x128xf32>
    %53 = vector.shape_cast %52 : vector<1x1x1x128xf32> to vector<1x128xf32>
    %54 = vector.shape_cast %51 : vector<1x128xf32> to vector<1x1x1x128xf32>
    tpu.vector_store %arg6[%c0_51, %c0_52, %c0_53, %c0_54], %54 {strides = array<i32>} : memref<1x1x1x128xf32, #tpu.memory_space<vmem>>, vector<1x1x1x128xf32>,
    return
  }
  func.func @transform_0(%arg0: i32, %arg1: i32) -> (i32, i32, i32, i32) {
    %c0_i32 = arith.constant 0 : i32
    %c0_i32_0 = arith.constant 0 : i32
    %c0_i32_1 = arith.constant 0 : i32
    return %arg0, %arg1, %c0_i32, %c0_i32_0 : i32, i32, i32, i32
  }
  func.func @transform_1(%arg0: i32, %arg1: i32) -> (i32, i32, i32, i32) {
    %c0_i32 = arith.constant 0 : i32
    %c0_i32_0 = arith.constant 0 : i32
    %c0_i32_1 = arith.constant 0 : i32
    return %arg0, %arg1, %c0_i32, %c0_i32_0 : i32, i32, i32, i32
  }
  func.func @transform_2(%arg0: i32, %arg1: i32) -> (i32, i32, i32) {
    %c0_i32 = arith.constant 0 : i32
    %c0_i32_0 = arith.constant 0 : i32
    %c0_i32_1 = arith.constant 0 : i32
    %c0_i32_2 = arith.constant 0 : i32
    return %c0_i32, %c0_i32_0, %c0_i32_1 : i32, i32, i32
  }
  func.func @transform_3(%arg0: i32, %arg1: i32) -> (i32, i32) {
    %c0_i32 = arith.constant 0 : i32
    %c0_i32_0 = arith.constant 0 : i32
    %c0_i32_1 = arith.constant 0 : i32
    return %c0_i32, %c0_i32_0 : i32, i32
  }
  func.func @transform_4(%arg0: i32, %arg1: i32) -> (i32, i32, i32, i32) {
    %c0_i32 = arith.constant 0 : i32
    %c0_i32_0 = arith.constant 0 : i32
    %c0_i32_1 = arith.constant 0 : i32
    return %arg0, %arg1, %c0_i32, %c0_i32_0 : i32, i32, i32, i32
  }
}

</mosaic_0001>

<bundles_post_ra>
// kernel: a_call__.2
= control target key start
LH: loop header
LB: loop body
LE: loop exit
PB: predicated region body
PF: predicated region fallthrough
CT: control target
= control target key end

     0   :  { %s2181_s18 = smov 0   ;;  %s2183_s19 = smov 0   ;;  %s2441_s0 = inlined_call_operand.vmem [shape: bf16[2,2,160,9], index: 0, kind: input, shape index: {}]   ;;  %s2442_s1 = inlined_call_operand.vmem [shape: bf16[2,2,160,9], index: 1, kind: input, shape index: {}]   ;;  %s2443_s2 = inlined_call_operand.vmem [shape: bf16[3,9,64], index: 2, kind: input, shape index: {}]   ;;  %s2444_s3 = inlined_call_operand.vmem [shape: f32[1,64], index: 3, kind: input, shape index: {}]   ;;  %s2445_s4 = inlined_call_operand.vmem [shape: bf16[2,2,32,128], index: 4, kind: output, shape index: {0}]   ;;  %s2446_s5 = inlined_call_operand.vmem [shape: f32[2,2,1,64], index: 5, kind: output, shape index: {1}]  }
   0x1   :  { %s2185_s20 = smov 0   ;;  %s2187_s21 = smov 0  }
   0x2   :  { %s2189_s22 = smov 0  }
   0x3 LB: > { %s25_s23 = sadd.s32 1, %s2139_s20  ;;  %s28_s24 = sadd.s32 1, %s2143_s21  ;;  %s2147_s22 = sphi %s2189_s22, %s16_s22   ;;  %s2143_s21 = sphi %s2187_s21, %s2450_s21   ;;  %s2139_s20 = sphi %s2185_s20, %s2449_s20   ;;  %s2135_s19 = sphi %s2183_s19, %s2448_s19   ;;  %s2131_s18 = sphi %s2181_s18, %s2447_s18  }
   0x4   : > { %p26_p0 = scmp.ge.s32.totalorder %s25_s23, 2  ;;  %p1674_p1 = scmp.ge.s32.totalorder %s2147_s22, 1 }
   0x5   : > { %p228_p2 = scmp.lt.s32.totalorder %s2147_s22, 5 }
   0x6   : > { %s2452_s23 = smov (%p26_p0, %s25_s23), 0  ;;  %s2454_s24 = smov (!%p26_p0, %s28_s24), %s2143_s21 }
   0x7   : > { %p229_p3 = pnand %p1674_p1, %p228_p2  ;;  %p30_p4 = scmp.ge.s32.totalorder %s2454_s24, 2 }
   0x8   : > { %v2072_v0 = vld [vmem:[%s2443_s2 + $0x8] sm:$0x1f] (!%p229_p3)   ;;  %vm408_vm0 = vcmask (!%p229_p3), 1043456   ;;  %vm409_vm1 = vcmask (!%p229_p3), 1044480   ;;  %p280_p5 = scmp.lt.s32.totalorder (!%p229_p3), %s2135_s19, 1  ;;  %p282_p6 = scmp.lt.s32.totalorder (!%p229_p3), %s2131_s18, 1 }
   0x9   : > { %s2456_s24 = smov (%p30_p4, %s2454_s24), 0  ;;  %232 = sbr.rel (%p229_p3) target bundleno = 465 (0x1d1), region = 36 }
   0xa   : > { %v2149_v1 = vmov (!%p229_p3), 65535   ;;  %v2075_v4 = vld [vmem:[%s2443_s2] sm:$0x1f] (!%p229_p3)   ;;  %vm383_vm2 = vcmask (!%p229_p3), 72704   ;;  %v2092_v7 = vld [vmem:[%s2443_s2 + $0x10] sm:$0x1f] (!%p229_p3)  }
   0xb   : > { %v410_v2 = vsel (!%p229_p3), %vm408_vm0, 4294967295, %v2149_v1  ;;  %v2321_v43 = vld [vmem:[%s2444_s3] ss:$0 sm:$0xff] (!%p229_p3)  ;;  %vm1409_vm3 = vcmask (!%p229_p3), 523264   ;;  %s2150_s25 = smov (!%p229_p3), 64   ;;  %vm1447_vm4 = vcmask (!%p229_p3), 516096  }
   0xc   : > { %v411_v3 = vsel (!%p229_p3), %vm409_vm1, %v410_v2, 0 }
   0xd   : > { %v413_v5 = vand.u32 (!%p229_p3), %v2072_v0, %v411_v3  ;;  %v526_v6 = vand.u32 (!%p229_p3), %v2075_v4, %v411_v3  ;;  %v714_v12 = vand.u32 (!%p229_p3), %v2092_v7, %v411_v3 }
   0xf   : > { %1900 = vmatprep.subr.bf16.mxu1 (!%p229_p3), %v413_v5  ;;  %1846 = vmatprep.subr.bf16.mxu0 (!%p229_p3), %v413_v5 }
  0x10   : > { %s2458_s19 = smov (!%p280_p5, %s2135_s19), 1  ;;  %s2460_s18 = smov (!%p282_p6, %s2131_s18), 1  ;;  %1901 = vmatpush3.bf16.msra.mxu1 %v413_v5  ;;  %1847 = vmatpush3.bf16.msra.mxu0 %v413_v5 }
  0x11   : > { %s2019_s29 = smul.u32 40, %s2458_s19  ;;  %1918 = vmatprep.subr.bf16.mxu1 %v526_v6  ;;  %1864 = vmatprep.subr.bf16.mxu0 %v526_v6  ;;  %s1680_s26 = sshll.u32 %s2458_s19, 1 }
  0x12   : > { %s2018_s30 = smul.u32 20, %s2460_s18  ;;  %s312_s27 = sadd.s32 %s1680_s26, %s2460_s18 }
  0x14   : > { %s286_s6 = sadd.s32 %s2019_s29, %s2018_s30  ;;  %s313_s30 = scalar_lea.vmem %s2446_s5, %s312_s27 }
  0x15   : > { %s1675_s7 = sshll.u32 %s286_s6, 2  ;;  %s1677_s6 = sshll.u32 %s2460_s18, 2 }
  0x16   : > { %s2226_s10 = scalar_lea.vmem %s2441_s0, %s1675_s7  ;;  %s2231_s13 = scalar_lea.vmem %s2442_s1, %s1675_s7 }
  0x17   : > { %v2073_v8 = vld [vmem:[%s2226_s10 + $0x8] sm:$0xff]   ;;  %v2076_v10 = vld [vmem:[%s2226_s10 + $0x10] sm:$0xff]   ;;  %v2078_v13 = vld [vmem:[%s2226_s10 + $0x18] sm:$0xff]   ;;  %s1678_s7 = sshll.u32 %s2458_s19, 3 }
  0x18   : > { %v2074_v9 = vld [vmem:[%s2231_s13 + $0x8] sm:$0xff]   ;;  %1848 = vmatprep.mubr.msk.bf16.mxu0 %vm383_vm2, %v2073_v8  ;;  %v2077_v11 = vld [vmem:[%s2231_s13 + $0x10] sm:$0xff]   ;;  %v2079_v14 = vld [vmem:[%s2231_s13 + $0x18] sm:$0xff]   ;;  %s304_s8 = sadd.s32 %s1678_s7, %s1677_s6 }
  0x19   : > { %1902 = vmatprep.mubr.msk.bf16.mxu1 %vm383_vm2, %v2074_v9  ;;  %1849 = vmatmul.mubr.msk.bf16.vlgmr.msra.gmra.mrb[0].mxu0 %vm383_vm2, %v2076_v10  ;;  %v2080_v15 = vld [vmem:[%s2226_s10 + $0x20] sm:$0xff]   ;;  %v2082_v17 = vld [vmem:[%s2226_s10 + $0x28] sm:$0xff]   ;;  %v2084_v19 = vld [vmem:[%s2226_s10 + $0x30] sm:$0xff]   ;;  %s1679_s9 = sshll.u32 %s304_s8, 2 }
  0x1a   : > { %1903 = vmatmul.mubr.msk.bf16.vlgmr.msra.gmra.mrb[0].mxu1 %vm383_vm2, %v2077_v11  ;;  %1865 = vmatpush3.bf16.msra.mxu0 %v526_v6  ;;  %v2081_v16 = vld [vmem:[%s2231_s13 + $0x20] sm:$0xff]   ;;  %v2083_v18 = vld [vmem:[%s2231_s13 + $0x28] sm:$0xff]   ;;  %v2085_v20 = vld [vmem:[%s2231_s13 + $0x30] sm:$0xff]   ;;  %s306_s18 = scalar_lea.vmem %s2445_s4, %s1679_s9 }
  0x1b   : > { %1919 = vmatpush3.bf16.msra.mxu1 %v526_v6  ;;  %1852 = vmatprep.mubr.msk.bf16.mxu0 %vm383_vm2, %v2078_v13  ;;  %v2086_v21 = vld [vmem:[%s2226_s10 + $0x38] sm:$0xff]   ;;  %v2088_v23 = vld [vmem:[%s2226_s10 + $0x40] sm:$0xff]   ;;  %v2093_v27 = vld [vmem:[%s2226_s10 + $0x10] sm:$0xff]  }
  0x1c   : > { %1906 = vmatprep.mubr.msk.bf16.mxu1 %vm383_vm2, %v2079_v14  ;;  %1936 = vmatprep.subr.bf16.mxu1 %v714_v12  ;;  %v2087_v22 = vld [vmem:[%s2231_s13 + $0x38] sm:$0xff]   ;;  %v2089_v24 = vld [vmem:[%s2231_s13 + $0x40] sm:$0xff]   ;;  %v2094_v28 = vld [vmem:[%s2231_s13 + $0x10] sm:$0xff]  }
  0x1d   : > { %1882 = vmatprep.subr.bf16.mxu0 %v714_v12  ;;  %v2090_v25 = vld [vmem:[%s2226_s10] sm:$0xff]   ;;  %v2095_v29 = vld [vmem:[%s2226_s10 + $0x18] sm:$0xff]   ;;  %v2099_v33 = vld [vmem:[%s2226_s10 + $0x28] sm:$0xff]  }
  0x1e   : > { %v2091_v26 = vld [vmem:[%s2231_s13] sm:$0xff]   ;;  %v2096_v30 = vld [vmem:[%s2231_s13 + $0x18] sm:$0xff]   ;;  %v2100_v34 = vld [vmem:[%s2231_s13 + $0x28] sm:$0xff]  }
  0x1f   : > { %v2097_v31 = vld [vmem:[%s2226_s10 + $0x20] sm:$0xff]   ;;  %v2101_v35 = vld [vmem:[%s2226_s10 + $0x30] sm:$0xff]   ;;  %v2103_v37 = vld [vmem:[%s2226_s10 + $0x38] sm:$0xff]  }
  0x20   : > { %v2098_v32 = vld [vmem:[%s2231_s13 + $0x20] sm:$0xff]   ;;  %v2102_v36 = vld [vmem:[%s2231_s13 + $0x30] sm:$0xff]   ;;  %v2104_v38 = vld [vmem:[%s2231_s13 + $0x38] sm:$0xff]  }
  0x21   : > { %1853 = vmatmul.mubr.msk.bf16.gmra.mrb[4].mxu0 %vm383_vm2, %v2080_v15  ;;  %v2105_v39 = vld [vmem:[%s2226_s10 + $0x40] sm:$0xff]   ;;  %v2107_v41 = vld [vmem:[%s2226_s10 + $0x48] sm:$0xff]  }
  0x22   : > { %1907 = vmatmul.mubr.msk.bf16.gmra.mrb[4].mxu1 %vm383_vm2, %v2081_v16  ;;  %1856 = vmatprep.mubr.msk.bf16.mxu0 %vm383_vm2, %v2082_v17  ;;  %v2106_v40 = vld [vmem:[%s2231_s13 + $0x40] sm:$0xff]   ;;  %v2108_v42 = vld [vmem:[%s2231_s13 + $0x48] sm:$0xff]  }
  0x23   : > { %1910 = vmatprep.mubr.msk.bf16.mxu1 %vm383_vm2, %v2083_v18 }
  0x29   : > { %1857 = vmatmul.mubr.msk.bf16.gmra.mrb[8].mxu0 %vm383_vm2, %v2084_v19 }
  0x2a   : > { %1911 = vmatmul.mubr.msk.bf16.gmra.mrb[8].mxu1 %vm383_vm2, %v2085_v20  ;;  %1860 = vmatprep.mubr.msk.bf16.mxu0 %vm383_vm2, %v2086_v21 }
  0x2b   : > { %1914 = vmatprep.mubr.msk.bf16.mxu1 %vm383_vm2, %v2087_v22 }
  0x31   : > { %1861 = vmatmul.mubr.msk.bf16.gmra.mrb[12].mxu0 %vm383_vm2, %v2088_v23 }
  0x32   : > { %1915 = vmatmul.mubr.msk.bf16.gmra.mrb[12].mxu1 %vm383_vm2, %v2089_v24  ;;  %1866 = vmatprep.mubr.msk.bf16.mxu0 %vm383_vm2, %v2090_v25 }
  0x33   : > { %1920 = vmatprep.mubr.msk.bf16.mxu1 %vm383_vm2, %v2091_v26 }
  0x39   : > { %1867 = vmatmul.mubr.msk.bf16.vlgmr.msra.gmra.mrb[0].mxu0 %vm383_vm2, %v2073_v8 }
  0x3a   : > { %1921 = vmatmul.mubr.msk.bf16.vlgmr.msra.gmra.mrb[0].mxu1 %vm383_vm2, %v2074_v9  ;;  %1870 = vmatprep.mubr.msk.bf16.mxu0 %vm383_vm2, %v2076_v10 }
  0x3b   : > { %1937 = vmatpush3.bf16.msra.mxu1 %v714_v12  ;;  %1924 = vmatprep.mubr.msk.bf16.mxu1 %vm383_vm2, %v2077_v11 }
  0x3c   : > { %1883 = vmatpush3.bf16.msra.mxu0 %v714_v12 }
  0x41   : > { %1871 = vmatmul.mubr.msk.bf16.gmra.mrb[4].mxu0 %vm383_vm2, %v2078_v13 }
  0x42   : > { %1925 = vmatmul.mubr.msk.bf16.gmra.mrb[4].mxu1 %vm383_vm2, %v2079_v14  ;;  %1874 = vmatprep.mubr.msk.bf16.mxu0 %vm383_vm2, %v2080_v15 }
  0x43   : > { %1928 = vmatprep.mubr.msk.bf16.mxu1 %vm383_vm2, %v2081_v16 }
  0x49   : > { %1875 = vmatmul.mubr.msk.bf16.gmra.mrb[8].mxu0 %vm383_vm2, %v2082_v17 }
  0x4a   : > { %1929 = vmatmul.mubr.msk.bf16.gmra.mrb[8].mxu1 %vm383_vm2, %v2083_v18  ;;  %1878 = vmatprep.mubr.msk.bf16.mxu0 %vm383_vm2, %v2084_v19 }
  0x4b   : > { %1932 = vmatprep.mubr.msk.bf16.mxu1 %vm383_vm2, %v2085_v20 }
  0x51   : > { %1879 = vmatmul.mubr.msk.bf16.gmra.mrb[12].mxu0 %vm383_vm2, %v2086_v21 }
  0x52   : > { %1933 = vmatmul.mubr.msk.bf16.gmra.mrb[12].mxu1 %vm383_vm2, %v2087_v22  ;;  %1884 = vmatprep.mubr.msk.bf16.mxu0 %vm383_vm2, %v2093_v27 }
  0x53   : > { %1938 = vmatprep.mubr.msk.bf16.mxu1 %vm383_vm2, %v2094_v28 }
  0x59   : > { %1885 = vmatmul.mubr.msk.bf16.vlgmr.msra.gmra.mrb[0].mxu0 %vm383_vm2, %v2095_v29 }
  0x5a   : > { %1939 = vmatmul.mubr.msk.bf16.vlgmr.msra.gmra.mrb[0].mxu1 %vm383_vm2, %v2096_v30  ;;  %1888 = vmatprep.mubr.msk.bf16.mxu0 %vm383_vm2, %v2097_v31 }
  0x5b   : > { %1942 = vmatprep.mubr.msk.bf16.mxu1 %vm383_vm2, %v2098_v32 }
  0x61   : > { %1889 = vmatmul.mubr.msk.bf16.gmra.mrb[4].mxu0 %vm383_vm2, %v2099_v33 }
  0x62   : > { %1943 = vmatmul.mubr.msk.bf16.gmra.mrb[4].mxu1 %vm383_vm2, %v2100_v34  ;;  %1892 = vmatprep.mubr.msk.bf16.mxu0 %vm383_vm2, %v2101_v35 }
  0x63   : > { %1946 = vmatprep.mubr.msk.bf16.mxu1 %vm383_vm2, %v2102_v36 }
  0x69   : > { %1893 = vmatmul.mubr.msk.bf16.gmra.mrb[8].mxu0 %vm383_vm2, %v2103_v37 }
  0x6a   : > { %1947 = vmatmul.mubr.msk.bf16.gmra.mrb[8].mxu1 %vm383_vm2, %v2104_v38  ;;  %1896 = vmatprep.mubr.msk.bf16.mxu0 %vm383_vm2, %v2105_v39 }
  0x6b   : > { %1950 = vmatprep.mubr.msk.bf16.mxu1 %vm383_vm2, %v2106_v40 }
  0x71   : > { %1897 = vmatmul.mubr.msk.bf16.gmra.mrb[12].mxu0 %vm383_vm2, %v2107_v41 }
  0x72   : > { %1951 = vmatmul.mubr.msk.bf16.gmra.mrb[12].mxu1 %vm383_vm2, %v2108_v42 }
 0x12c   : > { %v1886_v44 = vpop.f32.mrb[0].mxu0 }
 0x12d   : > { %v838_v45 = vadd.f32 %v1886_v44, %v2321_v43  ;;  %v1940_v46 = vpop.f32.mrb[0].mxu1  ;;  %v750_v47 = vpop.f32.mrb[1].mxu0 }
 0x12e   : > { %v1347_v48 = vadd.f32 %v1940_v46, %v2321_v43  ;;  %v836_v49 = vadd.f32 %v2321_v43, %v750_v47  ;;  %v1266_v50 = vpop.f32.mrb[1].mxu1  ;;  %v1887_v51 = vpop.f32.mrb[2].mxu0 }
 0x12f   : > { %v854_v52 = vmax.f32 %v838_v45, 0.0  ;;  %v1345_v53 = vadd.f32 %v2321_v43, %v1266_v50  ;;  %v839_v54 = vadd.f32 %v1887_v51, %v2321_v43  ;;  %v1941_v55 = vpop.f32.mrb[2].mxu1  ;;  %v753_v56 = vpop.f32.mrb[3].mxu0 }
 0x130   : > { %v1363_v57 = vmax.f32 %v1347_v48, 0.0  ;;  %v852_v58 = vmax.f32 %v836_v49, 0.0  ;;  %v1348_v59 = vadd.f32 %v1941_v55, %v2321_v43  ;;  %v837_v60 = vadd.f32 %v2321_v43, %v753_v56  ;;  %v1269_v61 = vpop.f32.mrb[3].mxu1 }
 0x131   : > { %v1361_v62 = vmax.f32 %v1345_v53, 0.0  ;;  %v855_v63 = vmax.f32 %v839_v54, 0.0  ;;  %v1346_v0 = vadd.f32 %v2321_v43, %v1269_v61 }
 0x132   : > { %v1379_v1 = vsub.f32 %v854_v52, %v1363_v57  ;;  %v1364_v2 = vmax.f32 %v1348_v59, 0.0  ;;  %v853_v3 = vmax.f32 %v837_v60, 0.0 }
 0x133   : > { %v1377_v4 = vsub.f32 %v852_v58, %v1361_v62  ;;  %v2331_v5 = vmax.f32 %v854_v52, %v855_v63  ;;  %v1362_v6 = vmax.f32 %v1346_v0, 0.0 }
 0x134   : > { %v1395_v7 = vmul.f32 %v1379_v1, %v1379_v1  ;;  %v1380_v8 = vsub.f32 %v855_v63, %v1364_v2  ;;  %v2333_v9 = vmax.f32 %v1363_v57, %v1364_v2  ;;  %v2335_v10 = vmax.f32 %v852_v58, %v853_v3  ;;  %v1890_v11 = vpop.f32.mrb[4].mxu0 }
 0x135   : > { %v1393_v12 = vmul.f32 %v1377_v4, %v1377_v4  ;;  %v1378_v13 = vsub.f32 %v853_v3, %v1362_v6  ;;  %v2337_v14 = vmax.f32 %v1361_v62, %v1362_v6  ;;  %v842_v15 = vadd.f32 %v1890_v11, %v2321_v43  ;;  %v1944_v16 = vpop.f32.mrb[4].mxu1  ;;  %v766_v17 = vpop.f32.mrb[5].mxu0 }
 0x136   : > { %v1413_v18 = vsel %vm1409_vm3, %v1395_v7, 0.0  ;;  %v1396_v19 = vmul.f32 %v1380_v8, %v1380_v8  ;;  %v1457_v20 = vmax.f32 %v2335_v10, %v2331_v5  ;;  %v1351_v21 = vadd.f32 %v1944_v16, %v2321_v43  ;;  %v1282_v22 = vpop.f32.mrb[5].mxu1  ;;  %v1891_v23 = vpop.f32.mrb[6].mxu0 }
 0x137   : > { %v1410_v24 = vsel %vm1409_vm3, %v1393_v12, 0.0  ;;  %v1394_v25 = vmul.f32 %v1378_v13, %v1378_v13  ;;  %v858_v26 = vmax.f32 %v842_v15, 0.0  ;;  %v840_v27 = vadd.f32 %v2321_v43, %v766_v17  ;;  %v1945_v28 = vpop.f32.mrb[6].mxu1  ;;  %v769_v29 = vpop.f32.mrb[7].mxu0 }
 0x138   : > { %v1415_v30 = vsel %vm1409_vm3, %v1396_v19, 0.0  ;;  %v1367_v31 = vmax.f32 %v1351_v21, 0.0  ;;  %v1349_v32 = vadd.f32 %v2321_v43, %v1282_v22  ;;  %v843_v33 = vadd.f32 %v1891_v23, %v2321_v43  ;;  %v1285_v34 = vpop.f32.mrb[7].mxu1 }
 0x139   : > { %v1411_v35 = vsel %vm1409_vm3, %v1394_v25, 0.0  ;;  %v856_v36 = vmax.f32 %v840_v27, 0.0  ;;  %v1352_v37 = vadd.f32 %v1945_v28, %v2321_v43  ;;  %v841_v38 = vadd.f32 %v2321_v43, %v769_v29 }
 0x13a   : > { %v1412_v39 = vadd.f32 %v1411_v35, %v1410_v24  ;;  %v1383_v40 = vsub.f32 %v858_v26, %v1367_v31  ;;  %v1365_v41 = vmax.f32 %v1349_v32, 0.0  ;;  %v859_v42 = vmax.f32 %v843_v33, 0.0 }
 0x13b   : > { %v1368_v44 = vmax.f32 %v1352_v37, 0.0  ;;  %v857_v45 = vmax.f32 %v841_v38, 0.0  ;;  %v1350_v46 = vadd.f32 %v2321_v43, %v1285_v34  ;;  %v1469_v47 = vmax.f32 %v2337_v14, %v2333_v9 }
 0x13c   : > { %v1414_v48 = vadd.f32 %v1413_v18, %v1412_v39  ;;  %v1399_v49 = vmul.f32 %v1383_v40, %v1383_v40  ;;  %v1381_v50 = vsub.f32 %v856_v36, %v1365_v41  ;;  %v2355_v51 = vmax.f32 %v858_v26, %v859_v42  ;;  %v1894_v52 = vpop.f32.mrb[8].mxu0 }
 0x13d   : > { %v1384_v53 = vsub.f32 %v859_v42, %v1368_v44  ;;  %v2357_v54 = vmax.f32 %v1367_v31, %v1368_v44  ;;  %v2359_v55 = vmax.f32 %v856_v36, %v857_v45  ;;  %v1366_v56 = vmax.f32 %v1350_v46, 0.0  ;;  %v1948_v57 = vpop.f32.mrb[8].mxu1  ;;  %v782_v58 = vpop.f32.mrb[9].mxu0 }
 0x13e   : > { %v1421_v59 = vsel %vm1409_vm3, %v1399_v49, 0.0  ;;  %v1397_v60 = vmul.f32 %v1381_v50, %v1381_v50  ;;  %v1416_v61 = vadd.f32 %v1415_v30, %v1414_v48  ;;  %v846_v62 = vadd.f32 %v1894_v52, %v2321_v43  ;;  %v1298_v63 = vpop.f32.mrb[9].mxu1  ;;  %v1895_v0 = vpop.f32.mrb[10].mxu0 }
 0x13f   : > { %v1400_v1 = vmul.f32 %v1384_v53, %v1384_v53  ;;  %v1458_v2 = vmax.f32 %v2359_v55, %v2355_v51  ;;  %v1382_v3 = vsub.f32 %v857_v45, %v1366_v56  ;;  %v1463_v4 = vmax.f32 %v1365_v41, %v1366_v56  ;;  %v1949_v6 = vpop.f32.mrb[10].mxu1  ;;  %v785_v7 = vpop.f32.mrb[11].mxu0 }
 0x140   : > { %v1417_v8 = vsel %vm1409_vm3, %v1397_v60, 0.0  ;;  %v862_v11 = vmax.f32 %v846_v62, 0.0  ;;  %v1355_v12 = vadd.f32 %v1948_v57, %v2321_v43  ;;  %v844_v13 = vadd.f32 %v2321_v43, %v782_v58  ;;  %v1301_v15 = vpop.f32.mrb[11].mxu1 }
 0x141   : > { %v1418_v16 = vadd.f32 %v1417_v8, %v1416_v61  ;;  %v1423_v17 = vsel %vm1409_vm3, %v1400_v1, 0.0  ;;  %v1398_v18 = vmul.f32 %v1382_v3, %v1382_v3  ;;  %v1353_v19 = vadd.f32 %v2321_v43, %v1298_v63 }
 0x142   : > { %v1371_v21 = vmax.f32 %v1355_v12, 0.0  ;;  %v860_v22 = vmax.f32 %v844_v13, 0.0  ;;  %v847_v23 = vadd.f32 %v1895_v0, %v2321_v43  ;;  %v1356_v24 = vadd.f32 %v1949_v6, %v2321_v43 }
 0x143   : > { %v1419_v25 = vsel %vm1409_vm3, %v1398_v18, 0.0  ;;  %v1369_v26 = vmax.f32 %v1353_v19, 0.0  ;;  %v845_v27 = vadd.f32 %v2321_v43, %v785_v7  ;;  %v1354_v28 = vadd.f32 %v2321_v43, %v1301_v15 }
 0x144   : > { %v1420_v29 = vadd.f32 %v1419_v25, %v1418_v16  ;;  %v1387_v30 = vsub.f32 %v862_v11, %v1371_v21  ;;  %v863_v31 = vmax.f32 %v847_v23, 0.0  ;;  %v1372_v32 = vmax.f32 %v1356_v24, 0.0  ;;  %v1898_v33 = vpop.f32.mrb[12].mxu0 }
 0x145   : > { %v1385_v34 = vsub.f32 %v860_v22, %v1369_v26  ;;  %v861_v35 = vmax.f32 %v845_v27, 0.0  ;;  %v1370_v36 = vmax.f32 %v1354_v28, 0.0  ;;  %v1470_v37 = vmax.f32 %v1463_v4, %v2357_v54  ;;  %v1952_v38 = vpop.f32.mrb[12].mxu1  ;;  %v798_v39 = vpop.f32.mrb[13].mxu0 }
 0x146   : > { %v1422_v40 = vadd.f32 %v1421_v59, %v1420_v29  ;;  %v1403_v41 = vmul.f32 %v1387_v30, %v1387_v30  ;;  %v2376_v42 = vmax.f32 %v862_v11, %v863_v31  ;;  %v1388_v44 = vsub.f32 %v863_v31, %v1372_v32  ;;  %v1314_v45 = vpop.f32.mrb[13].mxu1  ;;  %v1899_v46 = vpop.f32.mrb[14].mxu0 }
 0x147   : > { %v1401_v48 = vmul.f32 %v1385_v34, %v1385_v34  ;;  %v1466_v49 = vmax.f32 %v1371_v21, %v1372_v32  ;;  %v2378_v50 = vmax.f32 %v860_v22, %v861_v35  ;;  %v1386_v52 = vsub.f32 %v861_v35, %v1370_v36  ;;  %v1953_v53 = vpop.f32.mrb[14].mxu1  ;;  %v801_v56 = vpop.f32.mrb[15].mxu0 }
 0x148   : > { %v1429_v57 = vsel %vm1409_vm3, %v1403_v41, 0.0  ;;  %v1424_v58 = vadd.f32 %v1423_v17, %v1422_v40  ;;  %v1465_v54 = vmax.f32 %v1369_v26, %v1370_v36  ;;  %v1317_v60 = vpop.f32.mrb[15].mxu1  ;;  %v2062_v63 = vpack.i.bf16 %v1470_v37, %v1469_v47 }
 0x149   : > { %v1425_v59 = vsel %vm1409_vm3, %v1401_v48, 0.0  ;;  %v1459_v61 = vmax.f32 %v2378_v50, %v2376_v42  ;;  %v1402_v62 = vmul.f32 %v1386_v52, %v1386_v52  ;;  %v1404_v1 = vmul.f32 %v1388_v44, %v1388_v44 }
 0x14a   : > { %v1426_v0 = vadd.f32 %v1425_v59, %v1424_v58  ;;  %v1471_v3 = vmax.f32 %v1465_v54, %v1466_v49  ;;  %v850_v4 = vadd.f32 %v1898_v33, %v2321_v43  ;;  %2063 = vrot.lane.b32.xlu0 %v2062_v63, %s2150_s25  ;;  %v1359_v7 = vadd.f32 %v1952_v38, %v2321_v43 }
 0x14b   : > { %v1427_v6 = vsel %vm1409_vm3, %v1402_v62, 0.0  ;;  %v848_v8 = vadd.f32 %v2321_v43, %v798_v39  ;;  %v1357_v11 = vadd.f32 %v2321_v43, %v1314_v45  ;;  %v851_v9 = vadd.f32 %v1899_v46, %v2321_v43 }
 0x14c   : > { %v1428_v12 = vadd.f32 %v1427_v6, %v1426_v0  ;;  %v866_v13 = vmax.f32 %v850_v4, 0.0  ;;  %v1360_v14 = vadd.f32 %v1953_v53, %v2321_v43  ;;  %v1375_v47 = vmax.f32 %v1359_v7, 0.0 }
 0x14d   : > { %v864_v15 = vmax.f32 %v848_v8, 0.0  ;;  %v1373_v16 = vmax.f32 %v1357_v11, 0.0  ;;  %v849_v17 = vadd.f32 %v2321_v43, %v801_v56  ;;  %v867_v19 = vmax.f32 %v851_v9, 0.0 }
 0x14e   : > { %v1430_v18 = vadd.f32 %v1429_v57, %v1428_v12  ;;  %v1376_v21 = vmax.f32 %v1360_v14, 0.0  ;;  %v1358_v22 = vadd.f32 %v2321_v43, %v1317_v60  ;;  %v1431_v23 = vsel %vm1409_vm3, %v1404_v1, 0.0 }
 0x14f   : > { %v1391_v24 = vsub.f32 %v866_v13, %v1375_v47  ;;  %v1389_v25 = vsub.f32 %v864_v15, %v1373_v16  ;;  %v865_v26 = vmax.f32 %v849_v17, 0.0  ;;  %v1456_v28 = vmax.f32 %v866_v13, %v867_v19 }
 0x150   : > { %v1432_v27 = vadd.f32 %v1431_v23, %v1430_v18  ;;  %v1392_v29 = vsub.f32 %v867_v19, %v1376_v21  ;;  %v1468_v30 = vmax.f32 %v1375_v47, %v1376_v21  ;;  %v1374_v33 = vmax.f32 %v1358_v22, 0.0 }
 0x151   : > { %v1405_v31 = vmul.f32 %v1389_v25, %v1389_v25  ;;  %v1455_v32 = vmax.f32 %v864_v15, %v865_v26  ;;  %v1407_v43 = vmul.f32 %v1391_v24, %v1391_v24 }
 0x152   : > { %v1390_v36 = vsub.f32 %v865_v26, %v1374_v33  ;;  %v1467_v38 = vmax.f32 %v1373_v16, %v1374_v33  ;;  %v1408_v41 = vmul.f32 %v1392_v29, %v1392_v29 }
 0x153   : > { %v1433_v34 = vsel %vm1409_vm3, %v1405_v31, 0.0  ;;  %v1460_v35 = vmax.f32 %v1455_v32, %v1456_v28  ;;  %v1437_v48 = vsel %vm1409_vm3, %v1407_v43, 0.0 }
 0x154   : > { %v1434_v37 = vadd.f32 %v1433_v34, %v1432_v27  ;;  %v1406_v39 = vmul.f32 %v1390_v36, %v1390_v36  ;;  %v1472_v40 = vmax.f32 %v1467_v38, %v1468_v30  ;;  %v1439_v52 = vsel %vm1409_vm3, %v1408_v41, 0.0 }
 0x156   : > { %v1435_v44 = vsel %vm1409_vm3, %v1406_v39, 0.0  ;;  %v2067_v46 = vpack.i.bf16 %v1472_v40, %v1471_v3 }
 0x157   : > { %v1436_v45 = vadd.f32 %v1435_v44, %v1434_v37 }
 0x158   : > { %2068 = vrot.lane.b32.xlu0 %v2067_v46, %s2150_s25 }
 0x159   : > { %v1438_v49 = vadd.f32 %v1437_v48, %v1436_v45 }
 0x15b   : > { %v1440_v53 = vadd.f32 %v1439_v52, %v1438_v49 }
 0x15d   : > { %v1441_v56 = vrot.slane %v1440_v53, 4 }
 0x15f   : > { %v1442_v57 = vadd.f32 %v1441_v56, %v1440_v53 }
 0x161   : > { %v1443_v58 = vrot.slane %v1442_v57, 2 }
 0x163   : > { %v1444_v54 = vadd.f32 %v1443_v58, %v1442_v57 }
 0x165   : > { %v1445_v60 = vrot.slane %v1444_v54, 1 }
 0x167   : > { %v1446_v59 = vadd.f32 %v1445_v60, %v1444_v54 }
 0x169   : > { %1448 = vst.msk [vmem:[%s313_s30] sm:$0x1] %vm1447_vm4, %v1446_v59 }
 0x1bc   : > { %v2064_v62 = vpop.permute.xlu0 %2063 }
 0x1bd   : > { %v2066_v63 = vunpack.i.h.bf16 %v2064_v62  ;;  %v2065_v0 = vunpack.i.l.bf16 %v2064_v62 }
 0x1bf   : > { %v1489_v1 = vsel %vm1409_vm3, %v1457_v20, %v2065_v0  ;;  %v1490_v3 = vsel %vm1409_vm3, %v1458_v2, %v2066_v63 }
 0x1c0   : > { %v1784_v4 = vpack.c.bf16 %v1490_v3, %v1489_v1 }
 0x1c2   : > { %1785 = vst [vmem:[%s306_s18] sm:$0xff] %v1784_v4  }
 0x1ca   : > { %v2069_v6 = vpop.permute.xlu0 %2068 }
 0x1cb   : > { %v2071_v7 = vunpack.i.h.bf16 %v2069_v6  ;;  %v2070_v8 = vunpack.i.l.bf16 %v2069_v6 }
 0x1cd   : > { %v1491_v5 = vsel %vm1409_vm3, %v1459_v61, %v2070_v8  ;;  %v1492_v10 = vsel %vm1409_vm3, %v1460_v35, %v2071_v7 }
 0x1ce   : > { %v1789_v20 = vpack.c.bf16 %v1492_v10, %v1491_v5 }
 0x1d0   : > { %1791 = vst [vmem:[%s306_s18 + $0x8] sm:$0xff] %v1789_v20  }
 0x1d1 PF: > { %s16_s22 = sadd.s32 1, %s2147_s22   ;;  %s2447_s18 = smov %s2139_s20 }
 0x1d2   : > { %p13_p7 = scmp.ge.s32.totalorder %s16_s22, 6   ;;  %s2448_s19 = smov %s2143_s21 }
 0x1d3   : > { %s2449_s20 = smov %s2452_s23  ;;  %s2450_s21 = smov %s2456_s24 }
 0x1d4   :  { %15 = sbr.rel (!%p13_p7) target bundleno = 3 (0x3), region = 83 }

// kernel: a_call__.3
= control target key start
LH: loop header
LB: loop body
LE: loop exit
PB: predicated region body
PF: predicated region fallthrough
CT: control target
= control target key end

     0   :  { %s1723_s15 = smov 0   ;;  %s1725_s16 = smov 0   ;;  %s2264_s0 = inlined_call_operand.vmem [shape: bf16[2,2,96,192], index: 0, kind: input, shape index: {}]   ;;  %s2265_s1 = inlined_call_operand.vmem [shape: bf16[2,2,96,192], index: 1, kind: input, shape index: {}]   ;;  %s2266_s2 = inlined_call_operand.vmem [shape: bf16[3,192,128], index: 2, kind: input, shape index: {}]   ;;  %s2267_s3 = inlined_call_operand.vmem [shape: f32[1,128], index: 3, kind: input, shape index: {}]   ;;  %s2268_s4 = inlined_call_operand.vmem [shape: f32[2,2,1,128], index: 4, kind: output, shape index: {}]  }
   0x1   :  { %s1727_s17 = smov 0   ;;  %s1729_s18 = smov 0  }
   0x2   :  { %s1731_s19 = smov 0  }
   0x3 LB: > { %s23_s20 = sadd.s32 1, %s1687_s17  ;;  %s26_s21 = sadd.s32 1, %s1691_s18  ;;  %s1695_s19 = sphi %s1731_s19, %s14_s19   ;;  %s1691_s18 = sphi %s1729_s18, %s2272_s18   ;;  %s1687_s17 = sphi %s1727_s17, %s2271_s17   ;;  %s1683_s16 = sphi %s1725_s16, %s2270_s16   ;;  %s1679_s15 = sphi %s1723_s15, %s2269_s15  }
   0x4   : > { %p24_p0 = scmp.ge.s32.totalorder %s23_s20, 2  ;;  %p1391_p1 = scmp.ge.s32.totalorder %s1695_s19, 1 }
   0x5   : > { %p198_p2 = scmp.lt.s32.totalorder %s1695_s19, 5 }
   0x6   : > { %s2274_s20 = smov (%p24_p0, %s23_s20), 0  ;;  %s2276_s21 = smov (!%p24_p0, %s26_s21), %s1691_s18 }
   0x7   : > { %p199_p3 = pnand %p1391_p1, %p198_p2  ;;  %p28_p4 = scmp.ge.s32.totalorder %s2276_s21, 2 }
   0x8   : > { %v1760_v0 = vld [vmem:[%s2266_s2 + $0x60] sm:$0xff] (!%p199_p3)   ;;  %v1697_v1 = vmov (!%p199_p3), 0   ;;  %v1773_v3 = vld [vmem:[%s2266_s2 + $0x68] sm:$0xff] (!%p199_p3)   ;;  %p239_p5 = scmp.lt.s32.totalorder (!%p199_p3), %s1683_s16, 1  ;;  %p241_p6 = scmp.lt.s32.totalorder (!%p199_p3), %s1679_s15, 1  ;;  %v1789_v5 = vld [vmem:[%s2266_s2 + $0x70] sm:$0xff] (!%p199_p3)  }
   0x9   : > { %s2278_s21 = smov (%p28_p4, %s2276_s21), 0  ;;  %202 = sbr.rel (%p199_p3) target bundleno = 419 (0x1a3), region = 36 }
   0xa   : > { %445 = vmatprep.subr.bf16.mxu0 (!%p199_p3), %v1697_v1  ;;  %594 = vmatprep.subr.bf16.mxu1 (!%p199_p3), %v1697_v1  ;;  %v1767_v2 = vld [vmem:[%s2266_s2] sm:$0xff] (!%p199_p3)   ;;  %v1780_v4 = vld [vmem:[%s2266_s2 + $0x8] sm:$0xff] (!%p199_p3)   ;;  %v1796_v6 = vld [vmem:[%s2266_s2 + $0x10] sm:$0xff] (!%p199_p3)   ;;  %vm432_vm0 = vcmask (!%p199_p3), 523264  }
   0xb   : > { %446 = vmatpush1.bf16.msra.mxu0 (!%p199_p3), %v1760_v0  ;;  %595 = vmatpush1.bf16.msra.mxu1 (!%p199_p3), %v1767_v2  ;;  %v1809_v7 = vld [vmem:[%s2266_s2 + $0x78] sm:$0xff] (!%p199_p3)   ;;  %v1825_v9 = vld [vmem:[%s2266_s2 + $0x80] sm:$0xff] (!%p199_p3)   ;;  %v1841_v11 = vld [vmem:[%s2266_s2 + $0x88] sm:$0xff] (!%p199_p3)  }
   0xc   : > { %447 = vmatprep.subr.bf16.mxu0 (!%p199_p3), %v1697_v1  ;;  %596 = vmatprep.subr.bf16.mxu1 (!%p199_p3), %v1697_v1  ;;  %v1816_v8 = vld [vmem:[%s2266_s2 + $0x18] sm:$0xff] (!%p199_p3)   ;;  %v1832_v10 = vld [vmem:[%s2266_s2 + $0x20] sm:$0xff] (!%p199_p3)   ;;  %v1848_v12 = vld [vmem:[%s2266_s2 + $0x28] sm:$0xff] (!%p199_p3)  }
   0xd   : > { %v1856_v13 = vld [vmem:[%s2266_s2 + $0x90] sm:$0xff] (!%p199_p3)   ;;  %v1878_v16 = vld [vmem:[%s2266_s2 + $0x98] sm:$0xff] (!%p199_p3)   ;;  %v1895_v19 = vld [vmem:[%s2266_s2 + $0xa0] sm:$0xff] (!%p199_p3)  }
   0xe   : > { %v1870_v14 = vld [vmem:[%s2266_s2 + $0x30] sm:$0xff] (!%p199_p3)   ;;  %v1886_v18 = vld [vmem:[%s2266_s2 + $0x38] sm:$0xff] (!%p199_p3)   ;;  %v1902_v20 = vld [vmem:[%s2266_s2 + $0x40] sm:$0xff] (!%p199_p3)  }
   0xf   : > { %448 = vmatpush1.bf16.msra.mxu0 (!%p199_p3), %v1773_v3  ;;  %597 = vmatpush1.bf16.msra.mxu1 (!%p199_p3), %v1780_v4  ;;  %v1909_v21 = vld [vmem:[%s2266_s2 + $0xa8] sm:$0xff] (!%p199_p3)   ;;  %v1923_v23 = vld [vmem:[%s2266_s2 + $0xb0] sm:$0xff] (!%p199_p3)   ;;  %v1944_v25 = vld [vmem:[%s2266_s2 + $0xb8] sm:$0xff] (!%p199_p3)  }
  0x10   : > { %449 = vmatprep.subr.bf16.mxu0 %v1697_v1  ;;  %s2280_s16 = smov (!%p239_p5, %s1683_s16), 1  ;;  %598 = vmatprep.subr.bf16.mxu1 %v1697_v1  ;;  %s2282_s15 = smov (!%p241_p6, %s1679_s15), 1  ;;  %v1916_v22 = vld [vmem:[%s2266_s2 + $0x48] sm:$0xff]   ;;  %v1930_v24 = vld [vmem:[%s2266_s2 + $0x50] sm:$0xff]   ;;  %v1951_v26 = vld [vmem:[%s2266_s2 + $0x58] sm:$0xff]  }
  0x11   : > { %s1543_s12 = smul.u32 48, %s2280_s16  ;;  %v1960_v29 = vld [vmem:[%s2266_s2 + $0xc0] sm:$0xff]   ;;  %v1970_v31 = vld [vmem:[%s2266_s2 + $0xc8] sm:$0xff]   ;;  %v1984_v33 = vld [vmem:[%s2266_s2 + $0xd0] sm:$0xff]   ;;  %s1394_s7 = sshll.u32 %s2280_s16, 1 }
  0x12   : > { %s1542_s13 = smul.u32 24, %s2282_s15  ;;  %v1997_v35 = vld [vmem:[%s2266_s2 + $0xd8] sm:$0xff]   ;;  %v2012_v37 = vld [vmem:[%s2266_s2 + $0xe0] sm:$0xff]   ;;  %v2025_v39 = vld [vmem:[%s2266_s2 + $0xe8] sm:$0xff]   ;;  %s262_s8 = sadd.s32 %s1394_s7, %s2282_s15 }
  0x13   : > { %450 = vmatpush1.bf16.msra.mxu0 %v1789_v5  ;;  %599 = vmatpush1.bf16.msra.mxu1 %v1796_v6  ;;  %v2042_v41 = vld [vmem:[%s2266_s2 + $0xf0] sm:$0xff]   ;;  %v2055_v43 = vld [vmem:[%s2266_s2 + $0xf8] sm:$0xff]   ;;  %v2068_v44 = vld [vmem:[%s2266_s2 + $0x100] sm:$0xff]  }
  0x14   : > { %451 = vmatprep.subr.bf16.mxu0 %v1697_v1  ;;  %600 = vmatprep.subr.bf16.mxu1 %v1697_v1  ;;  %s1835_s25 = sadd.s32 %s1543_s12, %s1542_s13  ;;  %v2077_v45 = vld [vmem:[%s2266_s2 + $0x108] sm:$0xff]   ;;  %v2086_v46 = vld [vmem:[%s2266_s2 + $0x110] sm:$0xff]   ;;  %v2095_v47 = vld [vmem:[%s2266_s2 + $0x118] sm:$0xff]   ;;  %s263_s12 = scalar_lea.vmem %s2268_s4, %s262_s8 }
  0x15   : > { %s1392_s30 = sshll.u32 %s1835_s25, 2 }
  0x16   : > { %s1863_s9 = scalar_lea.vmem %s2264_s0, %s1392_s30  ;;  %s1938_s14 = scalar_lea.vmem %s2265_s1, %s1392_s30 }
  0x17   : > { %452 = vmatpush1.bf16.msra.mxu0 %v1809_v7  ;;  %601 = vmatpush1.bf16.msra.mxu1 %v1816_v8  ;;  %v1611_v15 = vld [vmem:[%s1863_s9 + $0x14] ss:$8 sps:$4 sm:$0xff]   ;;  %v1614_v17 = vld [vmem:[%s1863_s9 + $0x4] ss:$8 sps:$4 sm:$0xff]   ;;  %v1609_v27 = vld [vmem:[%s1863_s9 + $0x10] ss:$8 sps:$4 sm:$0xff]  }
  0x18   : > { %453 = vmatprep.subr.bf16.mxu0 %v1697_v1  ;;  %602 = vmatprep.subr.bf16.mxu1 %v1697_v1  ;;  %v1612_v28 = vld [vmem:[%s1863_s9] ss:$8 sps:$4 sm:$0xff]   ;;  %v1620_v30 = vld [vmem:[%s1863_s9 + $0x24] ss:$8 sps:$4 sm:$0xff]   ;;  %v1990_v34 = vld [vmem:[%s1863_s9 + $0x34] ss:$8 sps:$4 sm:$0xff]  }
  0x19   : > { %1439 = vmatprep.mubr.msk.bf16.mxu0 %vm432_vm0, %v1611_v15  ;;  %1457 = vmatprep.mubr.msk.bf16.mxu1 %vm432_vm0, %v1614_v17  ;;  %v1977_v32 = vld [vmem:[%s1863_s9 + $0x20] ss:$8 sps:$4 sm:$0xff]   ;;  %v2005_v36 = vld [vmem:[%s1863_s9 + $0x30] ss:$8 sps:$4 sm:$0xff]   ;;  %v2018_v38 = vld [vmem:[%s1863_s9 + $0x44] ss:$8 sps:$4 sm:$0xff]  }
  0x1a   : > { %v2034_v40 = vld [vmem:[%s1863_s9 + $0x40] ss:$8 sps:$4 sm:$0xff]   ;;  %v2049_v42 = vld [vmem:[%s1938_s14 + $0x14] ss:$8 sps:$4 sm:$0xff]   ;;  %v2102_v48 = vld [vmem:[%s1938_s14 + $0x10] ss:$8 sps:$4 sm:$0xff]  }
  0x1b   : > { %454 = vmatpush1.bf16.msra.mxu0 %v1825_v9  ;;  %603 = vmatpush1.bf16.msra.mxu1 %v1832_v10  ;;  %v2109_v49 = vld [vmem:[%s1938_s14 + $0x24] ss:$8 sps:$4 sm:$0xff]   ;;  %v2125_v50 = vld [vmem:[%s1938_s14 + $0x20] ss:$8 sps:$4 sm:$0xff]   ;;  %v2129_v51 = vld [vmem:[%s1938_s14 + $0x34] ss:$8 sps:$4 sm:$0xff]  }
  0x1c   : > { %455 = vmatprep.subr.bf16.mxu0 %v1697_v1  ;;  %604 = vmatprep.subr.bf16.mxu1 %v1697_v1  ;;  %v1641_v52 = vld [vmem:[%s1863_s9 + $0x54] ss:$8 sps:$4 sm:$0xff]   ;;  %v1647_v53 = vld [vmem:[%s1938_s14 + $0x30] ss:$8 sps:$4 sm:$0xff]   ;;  %v1648_v54 = vld [vmem:[%s1938_s14 + $0x44] ss:$8 sps:$4 sm:$0xff]  }
  0x1d   : > { %v1644_v55 = vld [vmem:[%s1863_s9 + $0x50] ss:$8 sps:$4 sm:$0xff]   ;;  %v1653_v56 = vld [vmem:[%s1938_s14 + $0x4] ss:$8 sps:$4 sm:$0xff]   ;;  %v1650_v57 = vld [vmem:[%s1938_s14 + $0x40] ss:$8 sps:$4 sm:$0xff]  }
  0x1e   : > { %v1651_v58 = vld [vmem:[%s1938_s14] ss:$8 sps:$4 sm:$0xff]   ;;  %v1654_v59 = vld [vmem:[%s1938_s14 + $0x54] ss:$8 sps:$4 sm:$0xff]   ;;  %v1656_v60 = vld [vmem:[%s1938_s14 + $0x50] ss:$8 sps:$4 sm:$0xff]  }
  0x1f   : > { %456 = vmatpush1.bf16.msra.mxu0 %v1841_v11  ;;  %605 = vmatpush1.bf16.msra.mxu1 %v1848_v12 }
  0x20   : > { %457 = vmatprep.subr.bf16.mxu0 %v1697_v1  ;;  %606 = vmatprep.subr.bf16.mxu1 %v1697_v1 }
  0x23   : > { %458 = vmatpush1.bf16.msra.mxu0 %v1856_v13  ;;  %607 = vmatpush1.bf16.msra.mxu1 %v1870_v14 }
  0x24   : > { %459 = vmatprep.subr.bf16.mxu0 %v1697_v1  ;;  %608 = vmatprep.subr.bf16.mxu1 %v1697_v1 }
  0x27   : > { %460 = vmatpush1.bf16.msra.mxu0 %v1878_v16  ;;  %609 = vmatpush1.bf16.msra.mxu1 %v1886_v18 }
  0x28   : > { %461 = vmatprep.subr.bf16.mxu0 %v1697_v1  ;;  %610 = vmatprep.subr.bf16.mxu1 %v1697_v1 }
  0x2b   : > { %462 = vmatpush1.bf16.msra.mxu0 %v1895_v19  ;;  %611 = vmatpush1.bf16.msra.mxu1 %v1902_v20 }
  0x2c   : > { %463 = vmatprep.subr.bf16.mxu0 %v1697_v1  ;;  %612 = vmatprep.subr.bf16.mxu1 %v1697_v1 }
  0x2f   : > { %464 = vmatpush1.bf16.msra.mxu0 %v1909_v21  ;;  %613 = vmatpush1.bf16.msra.mxu1 %v1916_v22 }
  0x30   : > { %465 = vmatprep.subr.bf16.mxu0 %v1697_v1  ;;  %614 = vmatprep.subr.bf16.mxu1 %v1697_v1 }
  0x33   : > { %466 = vmatpush1.bf16.msra.mxu0 %v1923_v23  ;;  %615 = vmatpush1.bf16.msra.mxu1 %v1930_v24 }
  0x34   : > { %467 = vmatprep.subr.bf16.mxu0 %v1697_v1  ;;  %616 = vmatprep.subr.bf16.mxu1 %v1697_v1 }
  0x37   : > { %468 = vmatpush1.bf16.msra.mxu0 %v1944_v25  ;;  %617 = vmatpush1.bf16.msra.mxu1 %v1951_v26 }
  0x38   : > { %812 = vmatprep.subr.bf16.mxu0 %v1697_v1  ;;  %966 = vmatprep.subr.bf16.mxu1 %v1697_v1 }
  0x3a   : > { %478 = vmatmul.mubr.bf16.vlgmr.msra.gmra.mrb[0].mxu0 %v1609_v27  ;;  %627 = vmatmul.mubr.bf16.vlgmr.msra.gmra.mrb[0].mxu1 %v1612_v28 }
  0x3b   : > { %813 = vmatpush1.bf16.msra.mxu0 %v1960_v29  ;;  %967 = vmatpush1.bf16.msra.mxu1 %v1760_v0 }
  0x3c   : > { %814 = vmatprep.subr.bf16.mxu0 %v1697_v1  ;;  %968 = vmatprep.subr.bf16.mxu1 %v1697_v1 }
  0x3d   : > { %1440 = vmatprep.mubr.msk.bf16.mxu0 %vm432_vm0, %v1620_v30  ;;  %1458 = vmatprep.mubr.msk.bf16.mxu1 %vm432_vm0, %v1611_v15 }
  0x3f   : > { %815 = vmatpush1.bf16.msra.mxu0 %v1970_v31  ;;  %969 = vmatpush1.bf16.msra.mxu1 %v1773_v3 }
  0x40   : > { %816 = vmatprep.subr.bf16.mxu0 %v1697_v1  ;;  %970 = vmatprep.subr.bf16.mxu1 %v1697_v1 }
  0x42   : > { %486 = vmatmul.mubr.bf16.gmra.mrb[4].mxu0 %v1977_v32  ;;  %635 = vmatmul.mubr.bf16.gmra.mrb[4].mxu1 %v1609_v27 }
  0x43   : > { %817 = vmatpush1.bf16.msra.mxu0 %v1984_v33  ;;  %971 = vmatpush1.bf16.msra.mxu1 %v1789_v5 }
  0x44   : > { %818 = vmatprep.subr.bf16.mxu0 %v1697_v1  ;;  %972 = vmatprep.subr.bf16.mxu1 %v1697_v1 }
  0x45   : > { %1441 = vmatprep.mubr.msk.bf16.mxu0 %vm432_vm0, %v1990_v34  ;;  %1459 = vmatprep.mubr.msk.bf16.mxu1 %vm432_vm0, %v1620_v30 }
  0x47   : > { %819 = vmatpush1.bf16.msra.mxu0 %v1997_v35  ;;  %973 = vmatpush1.bf16.msra.mxu1 %v1809_v7 }
  0x48   : > { %820 = vmatprep.subr.bf16.mxu0 %v1697_v1  ;;  %974 = vmatprep.subr.bf16.mxu1 %v1697_v1 }
  0x4a   : > { %494 = vmatmul.mubr.bf16.gmra.mrb[8].mxu0 %v2005_v36  ;;  %643 = vmatmul.mubr.bf16.gmra.mrb[8].mxu1 %v1977_v32 }
  0x4b   : > { %821 = vmatpush1.bf16.msra.mxu0 %v2012_v37  ;;  %975 = vmatpush1.bf16.msra.mxu1 %v1825_v9 }
  0x4c   : > { %822 = vmatprep.subr.bf16.mxu0 %v1697_v1  ;;  %976 = vmatprep.subr.bf16.mxu1 %v1697_v1 }
  0x4d   : > { %1442 = vmatprep.mubr.msk.bf16.mxu0 %vm432_vm0, %v2018_v38  ;;  %1460 = vmatprep.mubr.msk.bf16.mxu1 %vm432_vm0, %v1990_v34 }
  0x4f   : > { %823 = vmatpush1.bf16.msra.mxu0 %v2025_v39  ;;  %977 = vmatpush1.bf16.msra.mxu1 %v1841_v11 }
  0x50   : > { %824 = vmatprep.subr.bf16.mxu0 %v1697_v1  ;;  %978 = vmatprep.subr.bf16.mxu1 %v1697_v1 }
  0x52   : > { %502 = vmatmul.mubr.bf16.gmra.mrb[12].mxu0 %v2034_v40  ;;  %651 = vmatmul.mubr.bf16.gmra.mrb[12].mxu1 %v2005_v36 }
  0x53   : > { %825 = vmatpush1.bf16.msra.mxu0 %v2042_v41  ;;  %979 = vmatpush1.bf16.msra.mxu1 %v1856_v13 }
  0x54   : > { %826 = vmatprep.subr.bf16.mxu0 %v1697_v1  ;;  %980 = vmatprep.subr.bf16.mxu1 %v1697_v1 }
  0x55   : > { %1505 = vmatprep.mubr.msk.bf16.mxu0 %vm432_vm0, %v1620_v30  ;;  %1518 = vmatprep.mubr.msk.bf16.mxu1 %vm432_vm0, %v2049_v42 }
  0x57   : > { %827 = vmatpush1.bf16.msra.mxu0 %v2055_v43  ;;  %981 = vmatpush1.bf16.msra.mxu1 %v1878_v16 }
  0x58   : > { %828 = vmatprep.subr.bf16.mxu0 %v1697_v1  ;;  %982 = vmatprep.subr.bf16.mxu1 %v1697_v1 }
  0x5b   : > { %829 = vmatpush1.bf16.msra.mxu0 %v2068_v44  ;;  %983 = vmatpush1.bf16.msra.mxu1 %v1895_v19 }
  0x5c   : > { %830 = vmatprep.subr.bf16.mxu0 %v1697_v1  ;;  %984 = vmatprep.subr.bf16.mxu1 %v1697_v1 }
  0x5f   : > { %831 = vmatpush1.bf16.msra.mxu0 %v2077_v45  ;;  %985 = vmatpush1.bf16.msra.mxu1 %v1909_v21 }
  0x60   : > { %832 = vmatprep.subr.bf16.mxu0 %v1697_v1  ;;  %986 = vmatprep.subr.bf16.mxu1 %v1697_v1 }
  0x63   : > { %833 = vmatpush1.bf16.msra.mxu0 %v2086_v46  ;;  %987 = vmatpush1.bf16.msra.mxu1 %v1923_v23 }
  0x64   : > { %834 = vmatprep.subr.bf16.mxu0 %v1697_v1  ;;  %988 = vmatprep.subr.bf16.mxu1 %v1697_v1 }
  0x67   : > { %835 = vmatpush1.bf16.msra.mxu0 %v2095_v47  ;;  %989 = vmatpush1.bf16.msra.mxu1 %v1944_v25 }
  0x68   : > { %1043 = vmatprep.subr.bf16.mxu0 %v1697_v1  ;;  %1164 = vmatprep.subr.bf16.mxu1 %v1697_v1 }
  0x6a   : > { %845 = vmatmul.mubr.bf16.vlgmr.msra.gmra.mrb[16].mxu0 %v1977_v32  ;;  %999 = vmatmul.mubr.bf16.vlgmr.msra.gmra.mrb[16].mxu1 %v2102_v48 }
  0x6b   : > { %1044 = vmatpush1.bf16.msra.mxu0 %v1767_v2  ;;  %1165 = vmatpush1.bf16.msra.mxu1 %v1960_v29 }
  0x6c   : > { %1045 = vmatprep.subr.bf16.mxu0 %v1697_v1  ;;  %1166 = vmatprep.subr.bf16.mxu1 %v1697_v1 }
  0x6d   : > { %1506 = vmatprep.mubr.msk.bf16.mxu0 %vm432_vm0, %v1990_v34  ;;  %1519 = vmatprep.mubr.msk.bf16.mxu1 %vm432_vm0, %v2109_v49 }
  0x6f   : > { %1046 = vmatpush1.bf16.msra.mxu0 %v1780_v4  ;;  %1167 = vmatpush1.bf16.msra.mxu1 %v1970_v31 }
  0x70   : > { %1047 = vmatprep.subr.bf16.mxu0 %v1697_v1  ;;  %1168 = vmatprep.subr.bf16.mxu1 %v1697_v1 }
  0x72   : > { %853 = vmatmul.mubr.bf16.gmra.mrb[20].mxu0 %v2005_v36  ;;  %1007 = vmatmul.mubr.bf16.gmra.mrb[20].mxu1 %v2125_v50 }
  0x73   : > { %1048 = vmatpush1.bf16.msra.mxu0 %v1796_v6  ;;  %1507 = vmatprep.mubr.msk.bf16.mxu0 %vm432_vm0, %v2018_v38 }
  0x74   : > { %1169 = vmatpush1.bf16.msra.mxu1 %v1984_v33  ;;  %1049 = vmatprep.subr.bf16.mxu0 %v1697_v1 }
  0x75   : > { %1170 = vmatprep.subr.bf16.mxu1 %v1697_v1  ;;  %1520 = vmatprep.mubr.msk.bf16.mxu1 %vm432_vm0, %v2129_v51 }
  0x77   : > { %1050 = vmatpush1.bf16.msra.mxu0 %v1816_v8 }
  0x78   : > { %1171 = vmatpush1.bf16.msra.mxu1 %v1997_v35  ;;  %1051 = vmatprep.subr.bf16.mxu0 %v1697_v1 }
  0x79   : > { %1172 = vmatprep.subr.bf16.mxu1 %v1697_v1 }
  0x7a   : > { %861 = vmatmul.mubr.bf16.gmra.mrb[24].mxu0 %v2034_v40  ;;  %1015 = vmatmul.mubr.bf16.gmra.mrb[24].mxu1 %v1647_v53 }
  0x7b   : > { %1052 = vmatpush1.bf16.msra.mxu0 %v1832_v10  ;;  %1508 = vmatprep.mubr.msk.bf16.mxu0 %vm432_vm0, %v1641_v52 }
  0x7c   : > { %1173 = vmatpush1.bf16.msra.mxu1 %v2012_v37  ;;  %1053 = vmatprep.subr.bf16.mxu0 %v1697_v1 }
  0x7d   : > { %1174 = vmatprep.subr.bf16.mxu1 %v1697_v1  ;;  %1521 = vmatprep.mubr.msk.bf16.mxu1 %vm432_vm0, %v1648_v54 }
  0x7f   : > { %1054 = vmatpush1.bf16.msra.mxu0 %v1848_v12 }
  0x80   : > { %1175 = vmatpush1.bf16.msra.mxu1 %v2025_v39  ;;  %1055 = vmatprep.subr.bf16.mxu0 %v1697_v1 }
  0x81   : > { %1176 = vmatprep.subr.bf16.mxu1 %v1697_v1 }
  0x82   : > { %869 = vmatmul.mubr.bf16.gmra.mrb[28].mxu0 %v1644_v55  ;;  %1023 = vmatmul.mubr.bf16.gmra.mrb[28].mxu1 %v1650_v57 }
  0x83   : > { %1056 = vmatpush1.bf16.msra.mxu0 %v1870_v14  ;;  %1524 = vmatprep.mubr.msk.bf16.mxu0 %vm432_vm0, %v1653_v56 }
  0x84   : > { %1177 = vmatpush1.bf16.msra.mxu1 %v2042_v41  ;;  %1057 = vmatprep.subr.bf16.mxu0 %v1697_v1 }
  0x85   : > { %1178 = vmatprep.subr.bf16.mxu1 %v1697_v1  ;;  %1536 = vmatprep.mubr.msk.bf16.mxu1 %vm432_vm0, %v2109_v49 }
  0x87   : > { %1058 = vmatpush1.bf16.msra.mxu0 %v1886_v18 }
  0x88   : > { %1179 = vmatpush1.bf16.msra.mxu1 %v2055_v43  ;;  %1059 = vmatprep.subr.bf16.mxu0 %v1697_v1 }
  0x89   : > { %1180 = vmatprep.subr.bf16.mxu1 %v1697_v1 }
  0x8b   : > { %1060 = vmatpush1.bf16.msra.mxu0 %v1902_v20 }
  0x8c   : > { %1181 = vmatpush1.bf16.msra.mxu1 %v2068_v44  ;;  %1061 = vmatprep.subr.bf16.mxu0 %v1697_v1 }
  0x8d   : > { %1182 = vmatprep.subr.bf16.mxu1 %v1697_v1 }
  0x8f   : > { %1062 = vmatpush1.bf16.msra.mxu0 %v1916_v22 }
  0x90   : > { %1183 = vmatpush1.bf16.msra.mxu1 %v2077_v45  ;;  %1063 = vmatprep.subr.bf16.mxu0 %v1697_v1 }
  0x91   : > { %1184 = vmatprep.subr.bf16.mxu1 %v1697_v1 }
  0x93   : > { %1064 = vmatpush1.bf16.msra.mxu0 %v1930_v24 }
  0x94   : > { %1185 = vmatpush1.bf16.msra.mxu1 %v2086_v46  ;;  %1065 = vmatprep.subr.bf16.mxu0 %v1697_v1 }
  0x95   : > { %1186 = vmatprep.subr.bf16.mxu1 %v1697_v1 }
  0x97   : > { %1066 = vmatpush1.bf16.msra.mxu0 %v1951_v26 }
  0x98   : > { %1187 = vmatpush1.bf16.msra.mxu1 %v2095_v47 }
  0x9a   : > { %1076 = vmatmul.mubr.bf16.vlgmr.msra.gmra.mrb[32].mxu0 %v1651_v58 }
  0x9b   : > { %1197 = vmatmul.mubr.bf16.vlgmr.msra.gmra.mrb[32].mxu1 %v2125_v50  ;;  %1525 = vmatprep.mubr.msk.bf16.mxu0 %vm432_vm0, %v2049_v42 }
  0x9c   : > { %1537 = vmatprep.mubr.msk.bf16.mxu1 %vm432_vm0, %v2129_v51 }
  0xa2   : > { %1084 = vmatmul.mubr.bf16.gmra.mrb[36].mxu0 %v2102_v48 }
  0xa3   : > { %1205 = vmatmul.mubr.bf16.gmra.mrb[36].mxu1 %v1647_v53  ;;  %1526 = vmatprep.mubr.msk.bf16.mxu0 %vm432_vm0, %v2109_v49 }
  0xa4   : > { %1538 = vmatprep.mubr.msk.bf16.mxu1 %vm432_vm0, %v1648_v54 }
  0xaa   : > { %1092 = vmatmul.mubr.bf16.gmra.mrb[40].mxu0 %v2125_v50 }
  0xab   : > { %1213 = vmatmul.mubr.bf16.gmra.mrb[40].mxu1 %v1650_v57  ;;  %1527 = vmatprep.mubr.msk.bf16.mxu0 %vm432_vm0, %v2129_v51 }
  0xac   : > { %1539 = vmatprep.mubr.msk.bf16.mxu1 %vm432_vm0, %v1654_v59 }
  0xb2   : > { %1100 = vmatmul.mubr.bf16.gmra.mrb[44].mxu0 %v1647_v53 }
  0xb3   : > { %1221 = vmatmul.mubr.bf16.gmra.mrb[44].mxu1 %v1656_v60 }
 0x10d   : > { %v479_v61 = vpop.f32.mrb[0].mxu0  ;;  %v628_v62 = vpop.f32.mrb[0].mxu1 }
 0x10e   : > { %v481_v63 = vpop.f32.mrb[1].mxu0  ;;  %v629_v0 = vadd.f32 %v628_v62, %v479_v61  ;;  %v630_v1 = vpop.f32.mrb[1].mxu1 }
 0x10f   : > { %v482_v2 = vpop.f32.mrb[2].mxu0  ;;  %v631_v3 = vpop.f32.mrb[2].mxu1 }
 0x110   : > { %v484_v4 = vpop.f32.mrb[3].mxu0  ;;  %v632_v5 = vadd.f32 %v631_v3, %v482_v2  ;;  %v633_v6 = vpop.f32.mrb[3].mxu1 }
 0x115   : > { %v487_v7 = vpop.f32.mrb[4].mxu0  ;;  %v636_v9 = vpop.f32.mrb[4].mxu1 }
 0x116   : > { %v489_v8 = vpop.f32.mrb[5].mxu0  ;;  %v637_v10 = vadd.f32 %v636_v9, %v487_v7  ;;  %v638_v12 = vpop.f32.mrb[5].mxu1 }
 0x117   : > { %v490_v11 = vpop.f32.mrb[6].mxu0  ;;  %v639_v14 = vpop.f32.mrb[6].mxu1 }
 0x118   : > { %v492_v13 = vpop.f32.mrb[7].mxu0  ;;  %v640_v15 = vadd.f32 %v639_v14, %v490_v11  ;;  %v641_v16 = vpop.f32.mrb[7].mxu1 }
 0x119   : > { %v2219_v13 = vld [vmem:[%s2267_s3] ss:$0 sm:$0xff] }
 0x11d   : > { %v495_v17 = vpop.f32.mrb[8].mxu0  ;;  %v644_v19 = vpop.f32.mrb[8].mxu1 }
 0x11e   : > { %v497_v18 = vpop.f32.mrb[9].mxu0  ;;  %v645_v20 = vadd.f32 %v644_v19, %v495_v17  ;;  %v646_v22 = vpop.f32.mrb[9].mxu1 }
 0x11f   : > { %v498_v21 = vpop.f32.mrb[10].mxu0  ;;  %v647_v24 = vpop.f32.mrb[10].mxu1 }
 0x120   : > { %v500_v23 = vpop.f32.mrb[11].mxu0  ;;  %v648_v25 = vadd.f32 %v647_v24, %v498_v21  ;;  %v649_v26 = vpop.f32.mrb[11].mxu1 }
 0x125   : > { %v503_v27 = vpop.f32.mrb[12].mxu0  ;;  %v652_v29 = vpop.f32.mrb[12].mxu1 }
 0x126   : > { %v505_v28 = vpop.f32.mrb[13].mxu0  ;;  %v653_v30 = vadd.f32 %v652_v29, %v503_v27  ;;  %v654_v32 = vpop.f32.mrb[13].mxu1 }
 0x127   : > { %v506_v31 = vpop.f32.mrb[14].mxu0  ;;  %v655_v34 = vpop.f32.mrb[14].mxu1 }
 0x128   : > { %v508_v33 = vpop.f32.mrb[15].mxu0  ;;  %v656_v35 = vadd.f32 %v655_v34, %v506_v31  ;;  %v657_v36 = vpop.f32.mrb[15].mxu1 }
 0x13d   : > { %v846_v37 = vpop.f32.mrb[16].mxu0  ;;  %v1000_v39 = vpop.f32.mrb[16].mxu1 }
 0x13e   : > { %v877_v38 = vadd.f32 %v846_v37, %v629_v0  ;;  %v848_v40 = vpop.f32.mrb[17].mxu0  ;;  %v1002_v41 = vpop.f32.mrb[17].mxu1 }
 0x13f   : > { %v849_v42 = vpop.f32.mrb[18].mxu0  ;;  %v1003_v44 = vpop.f32.mrb[18].mxu1 }
 0x140   : > { %v878_v43 = vadd.f32 %v849_v42, %v632_v5  ;;  %v851_v45 = vpop.f32.mrb[19].mxu0  ;;  %v1005_v46 = vpop.f32.mrb[19].mxu1 }
 0x142   : > { %v893_v26 = vadd.f32 %v2219_v13, %v878_v43 }
 0x144   : > { %v901_v33 = vmax.f32 %v893_v26, 0.0 }
 0x145   : > { %v854_v47 = vpop.f32.mrb[20].mxu0  ;;  %v1008_v53 = vpop.f32.mrb[20].mxu1 }
 0x146   : > { %v879_v48 = vadd.f32 %v854_v47, %v637_v10  ;;  %v856_v49 = vpop.f32.mrb[21].mxu0  ;;  %v1010_v54 = vpop.f32.mrb[21].mxu1 }
 0x147   : > { %v857_v50 = vpop.f32.mrb[22].mxu0  ;;  %v1011_v55 = vpop.f32.mrb[22].mxu1 }
 0x148   : > { %v880_v51 = vadd.f32 %v857_v50, %v640_v15  ;;  %v859_v52 = vpop.f32.mrb[23].mxu0  ;;  %v1013_v56 = vpop.f32.mrb[23].mxu1  ;;  %v894_v41 = vadd.f32 %v2219_v13, %v879_v48 }
 0x14a   : > { %v895_v47 = vadd.f32 %v2219_v13, %v880_v51 }
 0x14c   : > { %v903_v48 = vmax.f32 %v895_v47, 0.0 }
 0x14d   : > { %v862_v57 = vpop.f32.mrb[24].mxu0  ;;  %v1016_v63 = vpop.f32.mrb[24].mxu1 }
 0x14e   : > { %v2202_v58 = vadd.f32 %v862_v57, %v645_v20  ;;  %v864_v59 = vpop.f32.mrb[25].mxu0  ;;  %v1018_v0 = vpop.f32.mrb[25].mxu1  ;;  %v892_v20 = vadd.f32 %v2219_v13, %v877_v38 }
 0x14f   : > { %v865_v60 = vpop.f32.mrb[26].mxu0  ;;  %v2206_v1 = vpop.f32.mrb[26].mxu1 }
 0x150   : > { %v2204_v61 = vadd.f32 %v865_v60, %v648_v25  ;;  %v867_v62 = vpop.f32.mrb[27].mxu0  ;;  %v1021_v2 = vpop.f32.mrb[27].mxu1  ;;  %v900_v29 = vmax.f32 %v892_v20, 0.0  ;;  %v896_v51 = vadd.f32 %v2219_v13, %v2202_v58 }
 0x155   : > { %v870_v3 = vpop.f32.mrb[28].mxu0  ;;  %v2212_v8 = vpop.f32.mrb[28].mxu1 }
 0x156   : > { %v2208_v4 = vadd.f32 %v870_v3, %v653_v30  ;;  %v872_v5 = vpop.f32.mrb[29].mxu0  ;;  %v1026_v10 = vpop.f32.mrb[29].mxu1 }
 0x157   : > { %v873_v6 = vpop.f32.mrb[30].mxu0  ;;  %v2214_v11 = vpop.f32.mrb[30].mxu1 }
 0x158   : > { %v2210_v7 = vadd.f32 %v873_v6, %v656_v35  ;;  %v875_v9 = vpop.f32.mrb[31].mxu0  ;;  %v1029_v12 = vpop.f32.mrb[31].mxu1 }
 0x16d   : > { %v1077_v14 = vpop.f32.mrb[32].mxu0 }
 0x16e   : > { %v1078_v15 = vadd.f32 %v1077_v14, %v1000_v39  ;;  %v1198_v16 = vpop.f32.mrb[32].mxu1  ;;  %v1079_v17 = vpop.f32.mrb[33].mxu0 }
 0x16f   : > { %v1200_v18 = vpop.f32.mrb[33].mxu1  ;;  %v1080_v19 = vpop.f32.mrb[34].mxu0 }
 0x170   : > { %v1229_v21 = vadd.f32 %v1198_v16, %v1078_v15  ;;  %v1081_v22 = vadd.f32 %v1080_v19, %v1003_v44  ;;  %v1201_v23 = vpop.f32.mrb[34].mxu1  ;;  %v1082_v24 = vpop.f32.mrb[35].mxu0  ;;  %v897_v18 = vadd.f32 %v2219_v13, %v2204_v61  ;;  %v898_v61 = vadd.f32 %v2219_v13, %v2208_v4 }
 0x171   : > { %v1203_v25 = vpop.f32.mrb[35].mxu1 }
 0x172   : > { %v1237_v27 = vadd.f32 %v2219_v13, %v1229_v21  ;;  %v1230_v28 = vadd.f32 %v1201_v23, %v1081_v22  ;;  %v904_v23 = vmax.f32 %v896_v51, 0.0  ;;  %v906_v4 = vmax.f32 %v898_v61, 0.0 }
 0x174   : > { %v1245_v30 = vmax.f32 %v1237_v27, 0.0  ;;  %v1238_v31 = vadd.f32 %v2219_v13, %v1230_v28  ;;  %v905_v27 = vmax.f32 %v897_v18, 0.0 }
 0x175   : > { %v1085_v32 = vpop.f32.mrb[36].mxu0 }
 0x176   : > { %v1253_v34 = vsub.f32 %v900_v29, %v1245_v30  ;;  %v1246_v35 = vmax.f32 %v1238_v31, 0.0  ;;  %v1086_v36 = vadd.f32 %v1085_v32, %v1008_v53  ;;  %v1206_v37 = vpop.f32.mrb[36].mxu1  ;;  %v1087_v38 = vpop.f32.mrb[37].mxu0  ;;  %v902_v53 = vmax.f32 %v894_v41, 0.0 }
 0x177   : > { %v1208_v39 = vpop.f32.mrb[37].mxu1  ;;  %v1088_v40 = vpop.f32.mrb[38].mxu0 }
 0x178   : > { %v1254_v42 = vsub.f32 %v901_v33, %v1246_v35  ;;  %v1231_v43 = vadd.f32 %v1206_v37, %v1086_v36  ;;  %v1089_v44 = vadd.f32 %v1088_v40, %v1011_v55  ;;  %v1209_v45 = vpop.f32.mrb[38].mxu1  ;;  %v1090_v46 = vpop.f32.mrb[39].mxu0  ;;  %v1261_v50 = vmul.f32 %v1253_v34, %v1253_v34 }
 0x179   : > { %v1211_v49 = vpop.f32.mrb[39].mxu1  ;;  %v899_v40 = vadd.f32 %v2219_v13, %v2210_v7 }
 0x17a   : > { %v1262_v52 = vmul.f32 %v1254_v42, %v1254_v42  ;;  %v1239_v54 = vadd.f32 %v2219_v13, %v1231_v43  ;;  %v1232_v56 = vadd.f32 %v1209_v45, %v1089_v44 }
 0x17b   : > { %v907_v49 = vmax.f32 %v899_v40, 0.0 }
 0x17c   : > { %v1269_v57 = vadd.f32 %v1262_v52, %v1261_v50  ;;  %v1247_v59 = vmax.f32 %v1239_v54, 0.0  ;;  %v1240_v60 = vadd.f32 %v2219_v13, %v1232_v56 }
 0x17d   : > { %v1093_v62 = vpop.f32.mrb[40].mxu0 }
 0x17e   : > { %v1255_v0 = vsub.f32 %v902_v53, %v1247_v59  ;;  %v1248_v2 = vmax.f32 %v1240_v60, 0.0  ;;  %v1094_v55 = vadd.f32 %v1093_v62, %v1016_v63  ;;  %v1214_v3 = vpop.f32.mrb[40].mxu1  ;;  %v1095_v5 = vpop.f32.mrb[41].mxu0 }
 0x17f   : > { %v1216_v6 = vpop.f32.mrb[41].mxu1  ;;  %v1096_v9 = vpop.f32.mrb[42].mxu0 }
 0x180   : > { %v1263_v10 = vmul.f32 %v1255_v0, %v1255_v0  ;;  %v1256_v12 = vsub.f32 %v903_v48, %v1248_v2  ;;  %v1233_v14 = vadd.f32 %v1214_v3, %v1094_v55  ;;  %v1097_v15 = vadd.f32 %v1096_v9, %v2206_v1  ;;  %v1217_v16 = vpop.f32.mrb[42].mxu1  ;;  %v1098_v17 = vpop.f32.mrb[43].mxu0 }
 0x181   : > { %v1219_v19 = vpop.f32.mrb[43].mxu1 }
 0x182   : > { %v1270_v20 = vadd.f32 %v1269_v57, %v1263_v10  ;;  %v1264_v63 = vmul.f32 %v1256_v12, %v1256_v12  ;;  %v1241_v21 = vadd.f32 %v2219_v13, %v1233_v14  ;;  %v1234_v22 = vadd.f32 %v1217_v16, %v1097_v15 }
 0x184   : > { %v1271_v58 = vadd.f32 %v1270_v20, %v1264_v63  ;;  %v1249_v24 = vmax.f32 %v1241_v21, 0.0  ;;  %v1242_v25 = vadd.f32 %v2219_v13, %v1234_v22 }
 0x185   : > { %v1101_v26 = vpop.f32.mrb[44].mxu0 }
 0x186   : > { %v1257_v28 = vsub.f32 %v904_v23, %v1249_v24  ;;  %v1250_v1 = vmax.f32 %v1242_v25, 0.0  ;;  %v1102_v29 = vadd.f32 %v1101_v26, %v2212_v8  ;;  %v1222_v30 = vpop.f32.mrb[44].mxu1  ;;  %v1103_v31 = vpop.f32.mrb[45].mxu0 }
 0x187   : > { %v1224_v32 = vpop.f32.mrb[45].mxu1  ;;  %v1104_v33 = vpop.f32.mrb[46].mxu0 }
 0x188   : > { %v1265_v34 = vmul.f32 %v1257_v28, %v1257_v28  ;;  %v1258_v35 = vsub.f32 %v905_v27, %v1250_v1  ;;  %v1235_v36 = vadd.f32 %v1222_v30, %v1102_v29  ;;  %v1105_v37 = vadd.f32 %v1104_v33, %v2214_v11  ;;  %v1225_v38 = vpop.f32.mrb[46].mxu1  ;;  %v1106_v39 = vpop.f32.mrb[47].mxu0 }
 0x189   : > { %v1227_v41 = vpop.f32.mrb[47].mxu1 }
 0x18a   : > { %v1272_v42 = vadd.f32 %v1271_v58, %v1265_v34  ;;  %v1266_v8 = vmul.f32 %v1258_v35, %v1258_v35  ;;  %v1243_v43 = vadd.f32 %v2219_v13, %v1235_v36  ;;  %v1236_v44 = vadd.f32 %v1225_v38, %v1105_v37 }
 0x18c   : > { %v1273_v45 = vadd.f32 %v1272_v42, %v1266_v8  ;;  %v1251_v46 = vmax.f32 %v1243_v43, 0.0  ;;  %v1244_v47 = vadd.f32 %v2219_v13, %v1236_v44 }
 0x18e   : > { %v1259_v11 = vsub.f32 %v906_v4, %v1251_v46  ;;  %v1252_v50 = vmax.f32 %v1244_v47, 0.0 }
 0x190   : > { %v1267_v52 = vmul.f32 %v1259_v11, %v1259_v11  ;;  %v1260_v54 = vsub.f32 %v907_v49, %v1252_v50 }
 0x192   : > { %v1274_v56 = vadd.f32 %v1273_v45, %v1267_v52  ;;  %v1268_v7 = vmul.f32 %v1260_v54, %v1260_v54 }
 0x194   : > { %v1275_v53 = vadd.f32 %v1274_v56, %v1268_v7 }
 0x196   : > { %v1276_v57 = vrot.slane %v1275_v53, 4 }
 0x198   : > { %v1277_v59 = vadd.f32 %v1276_v57, %v1275_v53 }
 0x19a   : > { %v1278_v60 = vrot.slane %v1277_v59, 2 }
 0x19c   : > { %v1279_v62 = vadd.f32 %v1278_v60, %v1277_v59 }
 0x19e   : > { %v1280_v48 = vrot.slane %v1279_v62, 1 }
 0x1a0   : > { %v1281_v13 = vadd.f32 %v1280_v48, %v1279_v62 }
 0x1a2   : > { %1282 = vst [vmem:[%s263_s12] sm:$0x1] %v1281_v13 }
 0x1a3 PF: > { %s14_s19 = sadd.s32 1, %s1695_s19   ;;  %s2269_s15 = smov %s1687_s17 }
 0x1a4   : > { %p11_p7 = scmp.ge.s32.totalorder %s14_s19, 6   ;;  %s2270_s16 = smov %s1691_s18 }
 0x1a5   : > { %s2271_s17 = smov %s2274_s20  ;;  %s2272_s18 = smov %s2278_s21 }
 0x1a6   :  { %13 = sbr.rel (!%p11_p7) target bundleno = 3 (0x3), region = 71 }

</bundles_post_ra>
